<compile_context>
chip_gen: v7x
topology: tpu7x:2x2x1
jax: 0.10.0
libtpu: 0.0.40
codegen_flags: <defaults>
</compile_context>

<pallas_src>
import jax
import jax.numpy as jnp
from jax.experimental import pallas as pl
from jax.experimental.pallas import tpu as pltpu

N_STATES = 3      # Pendulum-v1 observation size
N_ACTIONS = 1     # Pendulum-v1 action size
HID = 128
CAT = 2 * HID     # 256 = width of the concatenated encoder output
TB = 128          # batch rows per grid step (block M)

assert N_ACTIONS == 1  # the lane-reduce output heads below assume scalar actions

# packed-input layout: [s(3), s_next(3), eps, 0...] in a (., 16) row
X_WIDTH = 16
EPS_LANE = 2 * N_STATES


def _use_fused_hidden() -> bool:
    """True on 256-wide-MXU chips (v6e / v7x): fuse each mu/lv hidden-layer pair
    into ONE block-diagonal (256, 256) matmul.  On 128-wide MXUs (v5e, older)
    keep the split (128, 128) matmuls, per the perf review."""
    try:
        kind = jax.devices()[0].device_kind.lower()
    except Exception:
        return False
    return ("v6" in kind) or ("v7" in kind) or ("7x" in kind)


FUSE_HIDDEN = _use_fused_hidden()

# weight-blob row offsets (all multiples of 16 -> aligned bf16 sublane tiles)
R_ENC, N_ENC = 0, 16                      # block-diagonal [fcs | fcs_] encoder
R_W0 = R_ENC + N_ENC                      # 16  : [mu0_w | lv0_w]       (256, 256)
_HBLK = CAT if FUSE_HIDDEN else HID       # hidden-layer block height
R_W1 = R_W0 + CAT
R_W2 = R_W1 + _HBLK
R_W3 = R_W2 + _HBLK
R_TOTAL = R_W3 + _HBLK                    # 656 (split) or 1040 (fused)
_W_ROWS = (R_W1, R_W2, R_W3)
assert R_TOTAL % 16 == 0


# ----------------------------- kernel --------------------------------------

def planning_kernel(x_ref, w_ref, b_ref, out_ref):
    bf16, f32 = jnp.bfloat16, jnp.float32
    x = x_ref[...]                                    # (TB, 16) f32
    b = b_ref[...]                                    # (8, 256) f32

    # fused state encoders: h = [relu(fcs(s)) | relu(fcs_(s_next))]   (TB, 256)
    h = jnp.dot(x.astype(bf16), w_ref[R_ENC:R_ENC + N_ENC, :],
                preferred_element_type=f32) + b[0:1, :]
    h = jnp.maximum(h, 0.0)

    # fused layer 0 of both branches: one (TB,256) @ (256,256) matmul
    z0 = jnp.dot(h.astype(bf16), w_ref[R_W0:R_W0 + CAT, :],
                 preferred_element_type=f32) + b[1:2, :]

    if FUSE_HIDDEN:
        # v6e/v7x: each hidden layer is ONE block-diagonal (256,256) matmul,
        # activation kept as [m | v] concatenated along lanes.
        a = jnp.concatenate([jnp.tanh(z0[:, :HID]),
                             jnp.maximum(z0[:, HID:], 0.0)], axis=-1)
        for i, row in enumerate(_W_ROWS):
            z = jnp.dot(a.astype(bf16), w_ref[row:row + CAT, :],
                        preferred_element_type=f32) + b[2 + i:3 + i, :]
            a = jnp.concatenate([jnp.tanh(z[:, :HID]),
                                 jnp.maximum(z[:, HID:], 0.0)], axis=-1)
        m = a[:, :HID]
        v = a[:, HID:]
    else:
        # v5e: native 128-wide matmuls (two per hidden layer).
        m = jnp.tanh(z0[:, :HID])                     # planning_mu branch
        v = jnp.maximum(z0[:, HID:], 0.0)             # planning_log_var branch
        for i, row in enumerate(_W_ROWS):
            wi = w_ref[row:row + HID, :]              # (128, 256) bf16
            bi = b[2 + i:3 + i, :]                    # (1, 256)   f32
            m = jnp.tanh(jnp.dot(m.astype(bf16), wi[:, :HID],
                                 preferred_element_type=f32) + bi[:, :HID])
            v = jnp.maximum(jnp.dot(v.astype(bf16), wi[:, HID:],
                                    preferred_element_type=f32) + bi[:, HID:], 0.0)

    # scalar output heads as f32 lane dot-products (head vectors live in b_blob
    # row 6, so no bf16 sub-tile slice/unpack and no bf16 rounding at the end)
    head_mu = b[6:7, 0:HID]                           # (1, 128) f32
    head_lv = b[6:7, HID:CAT]                         # (1, 128) f32
    mu = jnp.sum(m * head_mu, axis=-1, keepdims=True) + b[5:6, 0:1]
    log_var = jnp.sum(v * head_lv, axis=-1, keepdims=True) + b[5:6, 1:2]

    # reparameterize: std = exp(0.5*logvar) + 1e-5, eps ~ U[0,1) (torch.rand_like)
    std = jnp.exp(0.5 * log_var) + 1e-5
    eps = x[:, EPS_LANE:EPS_LANE + 1]                 # (TB, 1)
    act = mu + std * eps

    # single lane-dense output tile: lane0 = act, lane1 = mu, lane2 = log_var
    lidx = jax.lax.broadcasted_iota(jnp.int32, (out_ref.shape[0], HID), 1)
    out_ref[...] = jnp.where(lidx == 0, act,
                             jnp.where(lidx == 1, mu,
                                       jnp.where(lidx == 2, log_var, 0.0)))


# ------------------- parameter init / packing (host side) ------------------

_MU_DIMS = [(CAT, HID), (HID, HID), (HID, HID), (HID, HID), (HID, N_ACTIONS)]


def init_params(key):
    """PyTorch-default-style U(-1/sqrt(fan_in), 1/sqrt(fan_in)) init."""
    def lin(k, fan_in, fan_out):
        kw, kb = jax.random.split(k)
        bound = float(fan_in) ** -0.5
        w = jax.random.uniform(kw, (fan_in, fan_out), jnp.float32, -bound, bound)
        b = jax.random.uniform(kb, (1, fan_out), jnp.float32, -bound, bound)
        return w, b

    keys = jax.random.split(key, 12)
    params = {}
    params["fcs_w"], params["fcs_b"] = lin(keys[0], N_STATES, HID)
    params["fcs__w"], params["fcs__b"] = lin(keys[1], N_STATES, HID)
    for i, (fi, fo) in enumerate(_MU_DIMS):
        params[f"mu{i}_w"], params[f"mu{i}_b"] = lin(keys[2 + i], fi, fo)
    for i, (fi, fo) in enumerate(_MU_DIMS):
        params[f"lv{i}_w"], params[f"lv{i}_b"] = lin(keys[7 + i], fi, fo)
    return params


def pack_params(params):
    """Pack all weights into one bf16 blob and all biases (+ f32 output heads)
    into one f32 (8, 256) blob, in the layout the kernel expects."""
    f32 = jnp.float32

    w_enc = jnp.zeros((N_ENC, CAT), f32)
    w_enc = w_enc.at[0:N_STATES, 0:HID].set(params["fcs_w"])
    w_enc = w_enc.at[N_STATES:2 * N_STATES, HID:CAT].set(params["fcs__w"])

    w0 = jnp.concatenate([params["mu0_w"], params["lv0_w"]], axis=1)     # (256,256)

    blocks = [w_enc, w0]
    zero_blk = jnp.zeros((HID, HID), f32)
    for i in (1, 2, 3):
        if FUSE_HIDDEN:
            top = jnp.concatenate([params[f"mu{i}_w"], zero_blk], axis=1)
            bot = jnp.concatenate([zero_blk, params[f"lv{i}_w"]], axis=1)
            blocks.append(jnp.concatenate([top, bot], axis=0))           # (256,256)
        else:
            blocks.append(jnp.concatenate([params[f"mu{i}_w"],
                                           params[f"lv{i}_w"]], axis=1))  # (128,256)

    w_blob = jnp.concatenate(blocks, axis=0)
    assert w_blob.shape == (R_TOTAL, CAT)
    w_blob = w_blob.astype(jnp.bfloat16)

    b_blob = jnp.zeros((8, CAT), f32)
    b_blob = b_blob.at[0, 0:HID].set(params["fcs_b"][0])
    b_blob = b_blob.at[0, HID:CAT].set(params["fcs__b"][0])
    for i in range(4):
        b_blob = b_blob.at[1 + i, 0:HID].set(params[f"mu{i}_b"][0])
        b_blob = b_blob.at[1 + i, HID:CAT].set(params[f"lv{i}_b"][0])
    b_blob = b_blob.at[5, 0].set(params["mu4_b"][0, 0])
    b_blob = b_blob.at[5, 1].set(params["lv4_b"][0, 0])
    # f32 output-head vectors (row 6): mu4_w in lanes 0:128, lv4_w in 128:256
    b_blob = b_blob.at[6, 0:HID].set(params["mu4_w"][:, 0])
    b_blob = b_blob.at[6, HID:CAT].set(params["lv4_w"][:, 0])
    return w_blob, b_blob


# ------------------------------- wrappers ------------------------------------

@jax.jit
def planning_forward_batch(s, s_next, w_blob, b_blob, key):
    """Batched forward: s, s_next are (B, N_STATES); returns (B, 1) act/mu/log_var."""
    B = s.shape[0]
    # eps ~ U[0,1) per sample, same distribution as torch.rand_like in reparameterize()
    eps = jax.random.uniform(key, (B,), jnp.float32)

    B_pad = ((B + TB - 1) // TB) * TB
    x = jnp.zeros((B_pad, X_WIDTH), jnp.float32)
    x = x.at[:B, 0:N_STATES].set(s.astype(jnp.float32))
    x = x.at[:B, N_STATES:2 * N_STATES].set(s_next.astype(jnp.float32))
    x = x.at[:B, EPS_LANE].set(eps)

    grid = (B_pad // TB,)
    out = pl.pallas_call(
        planning_kernel,
        out_shape=jax.ShapeDtypeStruct((B_pad, HID), jnp.float32),
        grid_spec=pltpu.PrefetchScalarGridSpec(
            num_scalar_prefetch=0,
            grid=grid,
            in_specs=[
                pl.BlockSpec((TB, X_WIDTH), lambda i: (i, 0)),       # per-block x
                pl.BlockSpec((R_TOTAL, CAT), lambda i: (0, 0)),      # weights: VMEM-resident
                pl.BlockSpec((8, CAT), lambda i: (0, 0)),            # biases + heads
            ],
            out_specs=pl.BlockSpec((TB, HID), lambda i: (i, 0)),
        ),
        compiler_params=pltpu.CompilerParams(
            dimension_semantics=("parallel",)),                      # v7x: 2 TCs
    )(x, w_blob, b_blob)

    act = out[:B, 0:N_ACTIONS]
    mu = out[:B, 1:1 + N_ACTIONS]
    log_var = out[:B, 2:2 + N_ACTIONS]
    return act, mu, log_var


def planning_forward(s, s_next, w_blob, b_blob, key):
    """Single-sample forward matching the original module's forward(s, s_next)."""
    return planning_forward_batch(s[None, :], s_next[None, :], w_blob, b_blob, key)


# --------------------------- pure-JAX reference ------------------------------

def planning_reference(s, s_next, params, eps):
    s = s.reshape(-1, N_STATES).astype(jnp.float32)
    sn = s_next.reshape(-1, N_STATES).astype(jnp.float32)
    h_s = jnp.maximum(s @ params["fcs_w"] + params["fcs_b"], 0.0)
    h_sn = jnp.maximum(sn @ params["fcs__w"] + params["fcs__b"], 0.0)
    x = jnp.concatenate([h_s, h_sn], axis=-1)
    m = x
    for i in range(4):
        m = jnp.tanh(m @ params[f"mu{i}_w"] + params[f"mu{i}_b"])
    mu = m @ params["mu4_w"] + params["mu4_b"]
    v = x
    for i in range(4):
        v = jnp.maximum(v @ params[f"lv{i}_w"] + params[f"lv{i}_b"], 0.0)
    log_var = v @ params["lv4_w"] + params["lv4_b"]
    std = jnp.exp(0.5 * log_var) + 1e-5
    act = mu + std * eps.reshape(-1, 1)
    return act, mu, log_var


if __name__ == "__main__":
    key = jax.random.PRNGKey(0)
    kp, ks, ksn, knoise, knoise1 = jax.random.split(key, 5)

    params = init_params(kp)
    w_blob, b_blob = pack_params(params)

    # batched evaluation: B (s, s_next) pairs -> grid of 2 blocks (TB=128)
    B = 200
    s = jax.random.normal(ks, (B, N_STATES), jnp.float32)
    s_next = jax.random.normal(ksn, (B, N_STATES), jnp.float32)

    act, mu, log_var = planning_forward_batch(s, s_next, w_blob, b_blob, knoise)
    jax.block_until_ready((act, mu, log_var))
    assert act.shape == (B, N_ACTIONS)
    assert mu.shape == (B, N_ACTIONS)
    assert log_var.shape == (B, N_ACTIONS)

    # sanity-check against a pure f32 JAX reference (loose tol: bf16 weights)
    eps = jax.random.uniform(knoise, (B,), jnp.float32)
    act_r, mu_r, lv_r = planning_reference(s, s_next, params, eps)
    assert jnp.allclose(mu, mu_r, atol=0.1, rtol=0.05), float(jnp.max(jnp.abs(mu - mu_r)))
    assert jnp.allclose(log_var, lv_r, atol=0.1, rtol=0.05), float(jnp.max(jnp.abs(log_var - lv_r)))
    assert jnp.allclose(act, act_r, atol=0.15, rtol=0.05), float(jnp.max(jnp.abs(act - act_r)))

    # single-sample call matching the original torch forward (unsqueeze(0))
    a1, m1, lv1 = planning_forward(s[0], s_next[0], w_blob, b_blob, knoise1)
    jax.block_until_ready((a1, m1, lv1))
    assert a1.shape == (1, N_ACTIONS) and m1.shape == (1, N_ACTIONS) and lv1.shape == (1, N_ACTIONS)

    print("KERNEL_OK")
</pallas_src>

<mosaic_0001>
module attributes {stable_mosaic.version = 11 : i64} {
  func.func @planning_kernel(%arg0: i32, %arg1: memref<128x16xf32, #tpu.memory_space<vmem>>, %arg2: memref<656x256xbf16, #tpu.memory_space<vmem>>, %arg3: memref<8x256xf32, #tpu.memory_space<vmem>>, %arg4: memref<128x128xf32, #tpu.memory_space<vmem>>) attributes {dimension_semantics = [#tpu.dimension_semantics<parallel>], iteration_bounds = array<i64: 2>, scalar_prefetch = 0 : i64, scratch_operands = 0 : i64, tpu.core_type = #tpu.core_type<tc>, window_params = [{transform_indices = @transform_0, window_bounds = array<i64: 128, 16>}, {pipeline_mode = #tpu.pipeline_mode<synchronous>, transform_indices = @transform_1, window_bounds = array<i64: 656, 256>}, {pipeline_mode = #tpu.pipeline_mode<synchronous>, transform_indices = @transform_2, window_bounds = array<i64: 8, 256>}, {transform_indices = @transform_3, window_bounds = array<i64: 128, 128>}]} {
    %c0 = arith.constant 0 : index
    %c0_0 = arith.constant 0 : index
    %0 = vector.load %arg1[%c0, %c0_0] : memref<128x16xf32, #tpu.memory_space<vmem>>, vector<128x16xf32>
    %c0_1 = arith.constant 0 : index
    %c0_2 = arith.constant 0 : index
    %1 = vector.load %arg3[%c0_1, %c0_2] : memref<8x256xf32, #tpu.memory_space<vmem>>, vector<8x256xf32>
    %2 = arith.truncf %0 : vector<128x16xf32> to vector<128x16xbf16>
    %c0_3 = arith.constant 0 : index
    %c0_4 = arith.constant 0 : index
    %3 = vector.load %arg2[%c0_3, %c0_4] : memref<656x256xbf16, #tpu.memory_space<vmem>>, vector<16x256xbf16>
    %cst = arith.constant dense<0.000000e+00> : vector<128x256xf32>
    %4 = tpu.matmul %2, %3, %cst {dimension_numbers = #tpu.dot_dimension_numbers<[1], [0], [0], [1], [0, 0, 1, 1], [], []>} : vector<128x16xbf16>, vector<16x256xbf16>, vector<128x256xf32> -> vector<128x256xf32>
    %5 = vector.extract_strided_slice %1 {offsets = [0, 0], sizes = [1, 256], strides = [1, 1]} : vector<8x256xf32> to vector<1x256xf32>
    %6 = vector.broadcast %5 : vector<1x256xf32> to vector<128x256xf32>
    %7 = arith.addf %4, %6 : vector<128x256xf32>
    %cst_5 = arith.constant 0.000000e+00 : f32
    %8 = vector.broadcast %cst_5 : f32 to vector<128x256xf32>
    %9 = arith.maximumf %7, %8 : vector<128x256xf32>
    %10 = arith.truncf %9 : vector<128x256xf32> to vector<128x256xbf16>
    %c16 = arith.constant 16 : index
    %c0_6 = arith.constant 0 : index
    %11 = vector.load %arg2[%c16, %c0_6] : memref<656x256xbf16, #tpu.memory_space<vmem>>, vector<256x256xbf16>
    %cst_7 = arith.constant dense<0.000000e+00> : vector<128x256xf32>
    %12 = tpu.matmul %10, %11, %cst_7 {dimension_numbers = #tpu.dot_dimension_numbers<[1], [0], [0], [1], [0, 0, 1, 1], [], []>} : vector<128x256xbf16>, vector<256x256xbf16>, vector<128x256xf32> -> vector<128x256xf32>
    %13 = vector.extract_strided_slice %1 {offsets = [1, 0], sizes = [1, 256], strides = [1, 1]} : vector<8x256xf32> to vector<1x256xf32>
    %14 = vector.broadcast %13 : vector<1x256xf32> to vector<128x256xf32>
    %15 = arith.addf %12, %14 : vector<128x256xf32>
    %16 = vector.extract_strided_slice %15 {offsets = [0, 0], sizes = [128, 128], strides = [1, 1]} : vector<128x256xf32> to vector<128x128xf32>
    %17 = math.tanh %16 : vector<128x128xf32>
    %18 = vector.extract_strided_slice %15 {offsets = [0, 128], sizes = [128, 128], strides = [1, 1]} : vector<128x256xf32> to vector<128x128xf32>
    %cst_8 = arith.constant 0.000000e+00 : f32
    %19 = vector.broadcast %cst_8 : f32 to vector<128x128xf32>
    %20 = arith.maximumf %18, %19 : vector<128x128xf32>
    %c272 = arith.constant 272 : index
    %c0_9 = arith.constant 0 : index
    %21 = vector.load %arg2[%c272, %c0_9] : memref<656x256xbf16, #tpu.memory_space<vmem>>, vector<128x256xbf16>
    %22 = vector.extract_strided_slice %1 {offsets = [2, 0], sizes = [1, 256], strides = [1, 1]} : vector<8x256xf32> to vector<1x256xf32>
    %23 = arith.truncf %17 : vector<128x128xf32> to vector<128x128xbf16>
    %24 = vector.extract_strided_slice %21 {offsets = [0, 0], sizes = [128, 128], strides = [1, 1]} : vector<128x256xbf16> to vector<128x128xbf16>
    %cst_10 = arith.constant dense<0.000000e+00> : vector<128x128xf32>
    %25 = tpu.matmul %23, %24, %cst_10 {dimension_numbers = #tpu.dot_dimension_numbers<[1], [0], [0], [1], [0, 0, 1, 1], [], []>} : vector<128x128xbf16>, vector<128x128xbf16>, vector<128x128xf32> -> vector<128x128xf32>
    %26 = vector.extract_strided_slice %22 {offsets = [0, 0], sizes = [1, 128], strides = [1, 1]} : vector<1x256xf32> to vector<1x128xf32>
    %27 = vector.broadcast %26 : vector<1x128xf32> to vector<128x128xf32>
    %28 = arith.addf %25, %27 : vector<128x128xf32>
    %29 = math.tanh %28 : vector<128x128xf32>
    %30 = arith.truncf %20 : vector<128x128xf32> to vector<128x128xbf16>
    %31 = vector.extract_strided_slice %21 {offsets = [0, 128], sizes = [128, 128], strides = [1, 1]} : vector<128x256xbf16> to vector<128x128xbf16>
    %cst_11 = arith.constant dense<0.000000e+00> : vector<128x128xf32>
    %32 = tpu.matmul %30, %31, %cst_11 {dimension_numbers = #tpu.dot_dimension_numbers<[1], [0], [0], [1], [0, 0, 1, 1], [], []>} : vector<128x128xbf16>, vector<128x128xbf16>, vector<128x128xf32> -> vector<128x128xf32>
    %33 = vector.extract_strided_slice %22 {offsets = [0, 128], sizes = [1, 128], strides = [1, 1]} : vector<1x256xf32> to vector<1x128xf32>
    %34 = vector.broadcast %33 : vector<1x128xf32> to vector<128x128xf32>
    %35 = arith.addf %32, %34 : vector<128x128xf32>
    %cst_12 = arith.constant 0.000000e+00 : f32
    %36 = vector.broadcast %cst_12 : f32 to vector<128x128xf32>
    %37 = arith.maximumf %35, %36 : vector<128x128xf32>
    %c400 = arith.constant 400 : index
    %c0_13 = arith.constant 0 : index
    %38 = vector.load %arg2[%c400, %c0_13] : memref<656x256xbf16, #tpu.memory_space<vmem>>, vector<128x256xbf16>
    %39 = vector.extract_strided_slice %1 {offsets = [3, 0], sizes = [1, 256], strides = [1, 1]} : vector<8x256xf32> to vector<1x256xf32>
    %40 = arith.truncf %29 : vector<128x128xf32> to vector<128x128xbf16>
    %41 = vector.extract_strided_slice %38 {offsets = [0, 0], sizes = [128, 128], strides = [1, 1]} : vector<128x256xbf16> to vector<128x128xbf16>
    %cst_14 = arith.constant dense<0.000000e+00> : vector<128x128xf32>
    %42 = tpu.matmul %40, %41, %cst_14 {dimension_numbers = #tpu.dot_dimension_numbers<[1], [0], [0], [1], [0, 0, 1, 1], [], []>} : vector<128x128xbf16>, vector<128x128xbf16>, vector<128x128xf32> -> vector<128x128xf32>
    %43 = vector.extract_strided_slice %39 {offsets = [0, 0], sizes = [1, 128], strides = [1, 1]} : vector<1x256xf32> to vector<1x128xf32>
    %44 = vector.broadcast %43 : vector<1x128xf32> to vector<128x128xf32>
    %45 = arith.addf %42, %44 : vector<128x128xf32>
    %46 = math.tanh %45 : vector<128x128xf32>
    %47 = arith.truncf %37 : vector<128x128xf32> to vector<128x128xbf16>
    %48 = vector.extract_strided_slice %38 {offsets = [0, 128], sizes = [128, 128], strides = [1, 1]} : vector<128x256xbf16> to vector<128x128xbf16>
    %cst_15 = arith.constant dense<0.000000e+00> : vector<128x128xf32>
    %49 = tpu.matmul %47, %48, %cst_15 {dimension_numbers = #tpu.dot_dimension_numbers<[1], [0], [0], [1], [0, 0, 1, 1], [], []>} : vector<128x128xbf16>, vector<128x128xbf16>, vector<128x128xf32> -> vector<128x128xf32>
    %50 = vector.extract_strided_slice %39 {offsets = [0, 128], sizes = [1, 128], strides = [1, 1]} : vector<1x256xf32> to vector<1x128xf32>
    %51 = vector.broadcast %50 : vector<1x128xf32> to vector<128x128xf32>
    %52 = arith.addf %49, %51 : vector<128x128xf32>
    %cst_16 = arith.constant 0.000000e+00 : f32
    %53 = vector.broadcast %cst_16 : f32 to vector<128x128xf32>
    %54 = arith.maximumf %52, %53 : vector<128x128xf32>
    %c528 = arith.constant 528 : index
    %c0_17 = arith.constant 0 : index
    %55 = vector.load %arg2[%c528, %c0_17] : memref<656x256xbf16, #tpu.memory_space<vmem>>, vector<128x256xbf16>
    %56 = vector.extract_strided_slice %1 {offsets = [4, 0], sizes = [1, 256], strides = [1, 1]} : vector<8x256xf32> to vector<1x256xf32>
    %57 = arith.truncf %46 : vector<128x128xf32> to vector<128x128xbf16>
    %58 = vector.extract_strided_slice %55 {offsets = [0, 0], sizes = [128, 128], strides = [1, 1]} : vector<128x256xbf16> to vector<128x128xbf16>
    %cst_18 = arith.constant dense<0.000000e+00> : vector<128x128xf32>
    %59 = tpu.matmul %57, %58, %cst_18 {dimension_numbers = #tpu.dot_dimension_numbers<[1], [0], [0], [1], [0, 0, 1, 1], [], []>} : vector<128x128xbf16>, vector<128x128xbf16>, vector<128x128xf32> -> vector<128x128xf32>
    %60 = vector.extract_strided_slice %56 {offsets = [0, 0], sizes = [1, 128], strides = [1, 1]} : vector<1x256xf32> to vector<1x128xf32>
    %61 = vector.broadcast %60 : vector<1x128xf32> to vector<128x128xf32>
    %62 = arith.addf %59, %61 : vector<128x128xf32>
    %63 = math.tanh %62 : vector<128x128xf32>
    %64 = arith.truncf %54 : vector<128x128xf32> to vector<128x128xbf16>
    %65 = vector.extract_strided_slice %55 {offsets = [0, 128], sizes = [128, 128], strides = [1, 1]} : vector<128x256xbf16> to vector<128x128xbf16>
    %cst_19 = arith.constant dense<0.000000e+00> : vector<128x128xf32>
    %66 = tpu.matmul %64, %65, %cst_19 {dimension_numbers = #tpu.dot_dimension_numbers<[1], [0], [0], [1], [0, 0, 1, 1], [], []>} : vector<128x128xbf16>, vector<128x128xbf16>, vector<128x128xf32> -> vector<128x128xf32>
    %67 = vector.extract_strided_slice %56 {offsets = [0, 128], sizes = [1, 128], strides = [1, 1]} : vector<1x256xf32> to vector<1x128xf32>
    %68 = vector.broadcast %67 : vector<1x128xf32> to vector<128x128xf32>
    %69 = arith.addf %66, %68 : vector<128x128xf32>
    %cst_20 = arith.constant 0.000000e+00 : f32
    %70 = vector.broadcast %cst_20 : f32 to vector<128x128xf32>
    %71 = arith.maximumf %69, %70 : vector<128x128xf32>
    %72 = vector.extract_strided_slice %1 {offsets = [6, 0], sizes = [1, 128], strides = [1, 1]} : vector<8x256xf32> to vector<1x128xf32>
    %73 = vector.extract_strided_slice %1 {offsets = [6, 128], sizes = [1, 128], strides = [1, 1]} : vector<8x256xf32> to vector<1x128xf32>
    %74 = vector.broadcast %72 : vector<1x128xf32> to vector<128x128xf32>
    %75 = arith.mulf %63, %74 : vector<128x128xf32>
    %cst_21 = arith.constant dense<0.000000e+00> : vector<128xf32>
    %76 = vector.multi_reduction <add>, %75, %cst_21 [1] : vector<128x128xf32> to vector<128xf32>
    %77 = vector.shape_cast %76 : vector<128xf32> to vector<128x1xf32>
    %78 = vector.extract_strided_slice %1 {offsets = [5, 0], sizes = [1, 1], strides = [1, 1]} : vector<8x256xf32> to vector<1x1xf32>
    %79 = vector.broadcast %78 : vector<1x1xf32> to vector<128x1xf32>
    %80 = arith.addf %77, %79 : vector<128x1xf32>
    %81 = vector.broadcast %73 : vector<1x128xf32> to vector<128x128xf32>
    %82 = arith.mulf %71, %81 : vector<128x128xf32>
    %cst_22 = arith.constant dense<0.000000e+00> : vector<128xf32>
    %83 = vector.multi_reduction <add>, %82, %cst_22 [1] : vector<128x128xf32> to vector<128xf32>
    %84 = vector.shape_cast %83 : vector<128xf32> to vector<128x1xf32>
    %85 = vector.extract_strided_slice %1 {offsets = [5, 1], sizes = [1, 1], strides = [1, 1]} : vector<8x256xf32> to vector<1x1xf32>
    %86 = vector.broadcast %85 : vector<1x1xf32> to vector<128x1xf32>
    %87 = arith.addf %84, %86 : vector<128x1xf32>
    %cst_23 = arith.constant 5.000000e-01 : f32
    %88 = vector.broadcast %cst_23 : f32 to vector<128x1xf32>
    %89 = arith.mulf %88, %87 : vector<128x1xf32>
    %90 = math.exp %89 : vector<128x1xf32>
    %cst_24 = arith.constant 9.99999974E-6 : f32
    %91 = vector.broadcast %cst_24 : f32 to vector<128x1xf32>
    %92 = arith.addf %90, %91 : vector<128x1xf32>
    %93 = vector.extract_strided_slice %0 {offsets = [0, 6], sizes = [128, 1], strides = [1, 1]} : vector<128x16xf32> to vector<128x1xf32>
    %94 = arith.mulf %92, %93 : vector<128x1xf32>
    %95 = arith.addf %80, %94 : vector<128x1xf32>
    %96 = tpu.iota {dimensions = array<i32: 1>} : vector<128x128xi32>
    %c0_i32 = arith.constant 0 : i32
    %97 = vector.broadcast %c0_i32 : i32 to vector<128x128xi32>
    %98 = arith.cmpi eq, %96, %97 : vector<128x128xi32>
    %c1_i32 = arith.constant 1 : i32
    %99 = vector.broadcast %c1_i32 : i32 to vector<128x128xi32>
    %100 = arith.cmpi eq, %96, %99 : vector<128x128xi32>
    %c2_i32 = arith.constant 2 : i32
    %101 = vector.broadcast %c2_i32 : i32 to vector<128x128xi32>
    %102 = arith.cmpi eq, %96, %101 : vector<128x128xi32>
    %cst_25 = arith.constant 0.000000e+00 : f32
    %103 = vector.shape_cast %87 : vector<128x1xf32> to vector<128x1xf32>
    %104 = vector.broadcast %103 : vector<128x1xf32> to vector<128x128xf32>
    %105 = vector.broadcast %cst_25 : f32 to vector<128x128xf32>
    %106 = arith.select %102, %104, %105 : vector<128x128xi1>, vector<128x128xf32>
    %107 = vector.shape_cast %80 : vector<128x1xf32> to vector<128x1xf32>
    %108 = vector.broadcast %107 : vector<128x1xf32> to vector<128x128xf32>
    %109 = arith.select %100, %108, %106 : vector<128x128xi1>, vector<128x128xf32>
    %110 = vector.shape_cast %95 : vector<128x1xf32> to vector<128x1xf32>
    %111 = vector.broadcast %110 : vector<128x1xf32> to vector<128x128xf32>
    %112 = arith.select %98, %111, %109 : vector<128x128xi1>, vector<128x128xf32>
    %c0_26 = arith.constant 0 : index
    %c0_27 = arith.constant 0 : index
    %113 = vector.load %arg4[%c0_26, %c0_27] : memref<128x128xf32, #tpu.memory_space<vmem>>, vector<128x128xf32>
    tpu.vector_store %arg4[%c0_26, %c0_27], %112 {strides = array<i32>} : memref<128x128xf32, #tpu.memory_space<vmem>>, vector<128x128xf32>,
    return
  }
  func.func @transform_0(%arg0: i32) -> (i32, i32) {
    %c0_i32 = arith.constant 0 : i32
    %c0_i32_0 = arith.constant 0 : i32
    return %arg0, %c0_i32 : i32, i32
  }
  func.func @transform_1(%arg0: i32) -> (i32, i32) {
    %c0_i32 = arith.constant 0 : i32
    %c0_i32_0 = arith.constant 0 : i32
    %c0_i32_1 = arith.constant 0 : i32
    return %c0_i32, %c0_i32_0 : i32, i32
  }
  func.func @transform_2(%arg0: i32) -> (i32, i32) {
    %c0_i32 = arith.constant 0 : i32
    %c0_i32_0 = arith.constant 0 : i32
    %c0_i32_1 = arith.constant 0 : i32
    return %c0_i32, %c0_i32_0 : i32, i32
  }
  func.func @transform_3(%arg0: i32) -> (i32, i32) {
    %c0_i32 = arith.constant 0 : i32
    %c0_i32_0 = arith.constant 0 : i32
    return %arg0, %c0_i32 : i32, i32
  }
}

</mosaic_0001>

<bundles_post_ra>
// kernel: planning_forward_batch.1
= control target key start
LH: loop header
LB: loop body
LE: loop exit
PB: predicated region body
PF: predicated region fallthrough
CT: control target
= control target key end

     0   :  { %s3258_s12 = smov 0   ;;  %s4237_s0 = inlined_call_operand.vmem [shape: f32[256,16], index: 0, kind: input, shape index: {}]   ;;  %s4238_s1 = inlined_call_operand.vmem [shape: bf16[656,256], index: 1, kind: input, shape index: {}]   ;;  %s4239_s2 = inlined_call_operand.vmem [shape: f32[8,256], index: 2, kind: input, shape index: {}]   ;;  %s4240_s3 = inlined_call_operand.vmem [shape: f32[256,128], index: 3, kind: output, shape index: {}]  }
   0x1 LB: > { %s2519_s13 = sadd.s32 4294967295, %s3232_s12   ;;  %p2523_p0 = scmp.ge.s32.totalorder %s3232_s12, 1  ;;  %s3232_s12 = sphi %s3258_s12, %s13_s12  }
   0x2   : > { %p138_p1 = scmp.lt.s32.totalorder %s3232_s12, 3 }
   0x4   : > { %p139_p2 = pnand %p2523_p0, %p138_p1 }
   0x5   : > { %v2925_v0 = vld [vmem:[%s4238_s1 + $0x4] ss:$8 sps:$4 sm:$0xff] (!%p139_p2)   ;;  %s2524_s16 = sshll.u32 (!%p139_p2), %s2519_s13, 4  ;;  %v2927_v1 = vld [vmem:[%s4238_s1] ss:$8 sps:$4 sm:$0xff] (!%p139_p2)   ;;  %v3234_v2 = vmov (!%p139_p2), 0   ;;  %v203_v63 = vlaneseq (!%p139_p2) }
   0x6   : > { %142 = sbr.rel (%p139_p2) target bundleno = 1677 (0x68d), region = 32  ;;  %278 = vmatprep.mubr.bf16.mxu0 (!%p139_p2), %v3234_v2  ;;  %p163_p3 = scmp.lt.s32.totalorder (!%p139_p2), %s2524_s16, 31  ;;  %2920 = vset.pattern.permute.xlu1 (!%p139_p2), %v3234_v2  ;;  %v2928_v3 = vld [vmem:[%s4238_s1 + $0x14] ss:$8 sps:$4 sm:$0xff] (!%p139_p2)   ;;  %v2930_v4 = vld [vmem:[%s4238_s1 + $0x10] ss:$8 sps:$4 sm:$0xff] (!%p139_p2)  }
   0x7   : > { %246 = vmatprep.subr.bf16.mxu0 (!%p139_p2), %v2925_v0  ;;  %v2931_v5 = vld [vmem:[%s4238_s1 + $0x24] ss:$8 sps:$4 sm:$0xff] (!%p139_p2)   ;;  %607 = vmatprep.subr.bf16.mxu1 (!%p139_p2), %v2928_v3  ;;  %v2933_v6 = vld [vmem:[%s4238_s1 + $0x20] ss:$8 sps:$4 sm:$0xff] (!%p139_p2)   ;;  %v2934_v7 = vld [vmem:[%s4238_s1 + $0x34] ss:$8 sps:$4 sm:$0xff] (!%p139_p2)  }
   0x8   : > { %247 = vmatpush1.bf16.msra.mxu0 (!%p139_p2), %v2927_v1  ;;  %608 = vmatpush1.bf16.msra.mxu1 (!%p139_p2), %v2930_v4  ;;  %vm221_vm0 = vcmask (!%p139_p2), 130048   ;;  %v2936_v11 = vld [vmem:[%s4238_s1 + $0x30] ss:$8 sps:$4 sm:$0xff] (!%p139_p2)   ;;  %v2937_v12 = vld [vmem:[%s4238_s1 + $0x44] ss:$8 sps:$4 sm:$0xff] (!%p139_p2)   ;;  %v3424_v0 = vshrl.u32 (!%p139_p2), %v203_v63, 7 }
   0x9   : > { %609 = vmatprep.subr.bf16.mxu1 (!%p139_p2), %v2931_v5  ;;  %v2939_v15 = vld [vmem:[%s4238_s1 + $0x40] ss:$8 sps:$4 sm:$0xff] (!%p139_p2)   ;;  %v2940_v17 = vld [vmem:[%s4238_s1 + $0x54] ss:$8 sps:$4 sm:$0xff] (!%p139_p2)   ;;  %v2942_v18 = vld [vmem:[%s4238_s1 + $0x50] ss:$8 sps:$4 sm:$0xff] (!%p139_p2)  }
   0xa   : > { %v2943_v19 = vld [vmem:[%s4238_s1 + $0x64] ss:$8 sps:$4 sm:$0xff] (!%p139_p2)   ;;  %v2945_v22 = vld [vmem:[%s4238_s1 + $0x60] ss:$8 sps:$4 sm:$0xff] (!%p139_p2)   ;;  %v2946_v24 = vld [vmem:[%s4238_s1 + $0x74] ss:$8 sps:$4 sm:$0xff] (!%p139_p2)  }
   0xb   : > { %v2948_v25 = vld [vmem:[%s4238_s1 + $0x70] ss:$8 sps:$4 sm:$0xff] (!%p139_p2)   ;;  %v2949_v28 = vld [vmem:[%s4238_s1 + $0x84] ss:$8 sps:$4 sm:$0xff] (!%p139_p2)   ;;  %v2951_v29 = vld [vmem:[%s4238_s1 + $0x80] ss:$8 sps:$4 sm:$0xff] (!%p139_p2)  }
   0xc   : > { %610 = vmatpush1.bf16.msra.mxu1 (!%p139_p2), %v2933_v6  ;;  %v2952_v30 = vld [vmem:[%s4238_s1 + $0x94] ss:$8 sps:$4 sm:$0xff] (!%p139_p2)   ;;  %v2954_v32 = vld [vmem:[%s4238_s1 + $0x90] ss:$8 sps:$4 sm:$0xff] (!%p139_p2)   ;;  %v2955_v33 = vld [vmem:[%s4238_s1 + $0xa4] ss:$8 sps:$4 sm:$0xff] (!%p139_p2)  }
   0xd   : > { %s4242_s16 = smov (!%p163_p3, %s2524_s16), 31  ;;  %611 = vmatprep.subr.bf16.mxu1 %v2934_v7  ;;  %v2957_v36 = vld [vmem:[%s4238_s1 + $0xa0] ss:$8 sps:$4 sm:$0xff]   ;;  %v2958_v37 = vld [vmem:[%s4238_s1 + $0xb4] ss:$8 sps:$4 sm:$0xff]   ;;  %v205_v1 = vsub.s32 0, %v3424_v0 }
   0xe   : > { %s2525_s25 = sshll.u32 %s4242_s16, 3  ;;  %v2960_v39 = vld [vmem:[%s4238_s1 + $0xb0] ss:$8 sps:$4 sm:$0xff]   ;;  %v2961_v40 = vld [vmem:[%s4238_s1 + $0xc4] ss:$8 sps:$4 sm:$0xff]   ;;  %s3235_s24 = smov 123  }
   0xf   : > { %s3294_s30 = scalar_lea.vmem %s4237_s0, %s2525_s25  ;;  %v2963_v43 = vld [vmem:[%s4238_s1 + $0xc0] ss:$8 sps:$4 sm:$0xff]   ;;  %v2964_v45 = vld [vmem:[%s4238_s1 + $0xd4] ss:$8 sps:$4 sm:$0xff]   ;;  %v2966_v46 = vld [vmem:[%s4238_s1 + $0xd0] ss:$8 sps:$4 sm:$0xff]   ;;  %s4109_s6 = scalar_lea.vmem %s4240_s3, %s2525_s25 }
  0x10   : > { %v175_v8 = vld [vmem:[%s3294_s30] sm:$0xff]  ;;  %v176_v9 = vld [vmem:[%s3294_s30 + $0x8] sm:$0xff]  ;;  %v177_v13 = vld [vmem:[%s3294_s30 + $0x10] sm:$0xff]  ;;  %612 = vmatpush1.bf16.msra.mxu1 %v2936_v11  ;;  %s3237_s29 = smov 127  }
  0x11   : > { %v193_v10 = vpack.c.bf16 %v176_v9, %v175_v8  ;;  %v178_v14 = vld [vmem:[%s3294_s30 + $0x18] sm:$0xff]  ;;  %613 = vmatprep.subr.bf16.mxu1 %v2937_v12  ;;  %v179_v20 = vld [vmem:[%s3294_s30 + $0x20] sm:$0xff]  ;;  %v180_v21 = vld [vmem:[%s3294_s30 + $0x28] sm:$0xff] }
  0x12   : > { %v194_v16 = vpack.c.bf16 %v178_v14, %v177_v13  ;;  %v195_v23 = vpack.c.bf16 %v180_v21, %v179_v20  ;;  %v181_v26 = vld [vmem:[%s3294_s30 + $0x30] sm:$0xff]  ;;  %v182_v27 = vld [vmem:[%s3294_s30 + $0x38] sm:$0xff]  ;;  %v183_v34 = vld [vmem:[%s3294_s30 + $0x40] sm:$0xff] }
  0x13   : > { %2530 = vmatmul.mubr.msk.bf16.vlgmr.msra.gmra.mrb[0].mxu0 %vm221_vm0, %v193_v10  ;;  %v196_v31 = vpack.c.bf16 %v182_v27, %v181_v26  ;;  %v184_v35 = vld [vmem:[%s3294_s30 + $0x48] sm:$0xff]  ;;  %v185_v41 = vld [vmem:[%s3294_s30 + $0x50] sm:$0xff]  ;;  %v186_v42 = vld [vmem:[%s3294_s30 + $0x58] sm:$0xff] }
  0x14   : > { %288 = vmatprep.mubr.bf16.mxu0 %v3234_v2  ;;  %614 = vmatpush1.bf16.msra.mxu1 %v2939_v15  ;;  %v197_v38 = vpack.c.bf16 %v184_v35, %v183_v34  ;;  %v198_v44 = vpack.c.bf16 %v186_v42, %v185_v41  ;;  %v2967_v47 = vld [vmem:[%s4238_s1 + $0xe4] ss:$8 sps:$4 sm:$0xff]   ;;  %v189_v51 = vld [vmem:[%s3294_s30 + $0x70] sm:$0xff]  ;;  %v190_v52 = vld [vmem:[%s3294_s30 + $0x78] sm:$0xff] }
  0x15   : > { %615 = vmatprep.subr.bf16.mxu1 %v2940_v17  ;;  %v187_v48 = vld [vmem:[%s3294_s30 + $0x60] sm:$0xff]  ;;  %v188_v49 = vld [vmem:[%s3294_s30 + $0x68] sm:$0xff]  ;;  %v200_v53 = vpack.c.bf16 %v190_v52, %v189_v51  ;;  %v2970_v55 = vld [vmem:[%s4238_s1 + $0xf4] ss:$8 sps:$4 sm:$0xff]  }
  0x16   : > { %v199_v50 = vpack.c.bf16 %v188_v49, %v187_v48  ;;  %v2969_v54 = vld [vmem:[%s4238_s1 + $0xe0] ss:$8 sps:$4 sm:$0xff]   ;;  %v2972_v56 = vld [vmem:[%s4238_s1 + $0xf0] ss:$8 sps:$4 sm:$0xff]   ;;  %v2973_v57 = vld [vmem:[%s4238_s1 + $0x104] ss:$8 sps:$4 sm:$0xff]  }
  0x17   : > { %v2975_v58 = vld [vmem:[%s4238_s1 + $0x100] ss:$8 sps:$4 sm:$0xff]   ;;  %v2976_v59 = vld [vmem:[%s4238_s1 + $0x110] ss:$8 sps:$4 sm:$0xff]  }
  0x18   : > { %616 = vmatpush1.bf16.msra.mxu1 %v2942_v18  ;;  %v2978_v60 = vld [vmem:[%s4238_s1 + $0x120] ss:$8 sps:$4 sm:$0xff]   ;;  %2716 = vmatprep.subr.bf16.mxu0 %v2976_v59  ;;  %v2980_v61 = vld [vmem:[%s4238_s1 + $0x130] ss:$8 sps:$4 sm:$0xff]  }
  0x19   : > { %617 = vmatprep.subr.bf16.mxu1 %v2943_v19  ;;  %2717 = vmatpush3.bf16.msra.mxu0 %v2976_v59  ;;  %v2982_v62 = vld [vmem:[%s4238_s1 + $0x140] ss:$8 sps:$4 sm:$0xff]  }
  0x1a   : > { %2718 = vmatprep.subr.bf16.mxu0 %v2978_v60  ;;  %v3430_v3 = vld [vmem:[%s4239_s2] sm:$0xff]  ;;  %v3435_v4 = vld [vmem:[%s4239_s2 + $0x8] sm:$0xff] }
  0x1b   : > { %2531 = vmatmul.mubr.msk.bf16.gmra.mrb[4].mxu0 %vm221_vm0, %v194_v16  ;;  %v3438_v5 = vrot.slane %v3430_v3, %v205_v1  ;;  %v3441_v6 = vrot.slane %v3435_v4, %v205_v1 }
  0x1c   : > { %298 = vmatprep.mubr.bf16.mxu0 %v3234_v2  ;;  %618 = vmatpush1.bf16.msra.mxu1 %v2945_v22 }
  0x1d   : > { %619 = vmatprep.subr.bf16.mxu1 %v2946_v24  ;;  %2719 = vmatpush3.bf16.msra.mxu0 %v2978_v60 }
  0x1e   : > { %2720 = vmatprep.subr.bf16.mxu0 %v2980_v61 }
  0x20   : > { %620 = vmatpush1.bf16.msra.mxu1 %v2948_v25 }
  0x21   : > { %621 = vmatprep.subr.bf16.mxu1 %v2949_v28  ;;  %2721 = vmatpush3.bf16.msra.mxu0 %v2980_v61 }
  0x22   : > { %2722 = vmatprep.subr.bf16.mxu0 %v2982_v62 }
  0x23   : > { %2532 = vmatmul.mubr.msk.bf16.gmra.mrb[8].mxu0 %vm221_vm0, %v195_v23 }
  0x24   : > { %308 = vmatprep.mubr.bf16.mxu0 %v3234_v2  ;;  %622 = vmatpush1.bf16.msra.mxu1 %v2951_v29 }
  0x25   : > { %623 = vmatprep.subr.bf16.mxu1 %v2952_v30  ;;  %2723 = vmatpush3.bf16.msra.mxu0 %v2982_v62 }
  0x28   : > { %624 = vmatpush1.bf16.msra.mxu1 %v2954_v32 }
  0x29   : > { %625 = vmatprep.subr.bf16.mxu1 %v2955_v33 }
  0x2b   : > { %2533 = vmatmul.mubr.msk.bf16.gmra.mrb[12].mxu0 %vm221_vm0, %v196_v31 }
  0x2c   : > { %318 = vmatprep.mubr.bf16.mxu0 %v3234_v2  ;;  %626 = vmatpush1.bf16.msra.mxu1 %v2957_v36 }
  0x2d   : > { %627 = vmatprep.subr.bf16.mxu1 %v2958_v37 }
  0x30   : > { %628 = vmatpush1.bf16.msra.mxu1 %v2960_v39 }
  0x31   : > { %629 = vmatprep.subr.bf16.mxu1 %v2961_v40 }
  0x33   : > { %2534 = vmatmul.mubr.msk.bf16.gmra.mrb[16].mxu0 %vm221_vm0, %v197_v38 }
  0x34   : > { %328 = vmatprep.mubr.bf16.mxu0 %v3234_v2  ;;  %630 = vmatpush1.bf16.msra.mxu1 %v2963_v43 }
  0x35   : > { %631 = vmatprep.subr.bf16.mxu1 %v2964_v45 }
  0x38   : > { %632 = vmatpush1.bf16.msra.mxu1 %v2966_v46 }
  0x39   : > { %633 = vmatprep.subr.bf16.mxu1 %v2967_v47 }
  0x3b   : > { %2535 = vmatmul.mubr.msk.bf16.gmra.mrb[20].mxu0 %vm221_vm0, %v198_v44 }
  0x3c   : > { %338 = vmatprep.mubr.bf16.mxu0 %v3234_v2  ;;  %634 = vmatpush1.bf16.msra.mxu1 %v2969_v54 }
  0x3d   : > { %635 = vmatprep.subr.bf16.mxu1 %v2970_v55 }
  0x40   : > { %636 = vmatpush1.bf16.msra.mxu1 %v2972_v56 }
  0x41   : > { %637 = vmatprep.subr.bf16.mxu1 %v2973_v57 }
  0x43   : > { %2536 = vmatmul.mubr.msk.bf16.gmra.mrb[24].mxu0 %vm221_vm0, %v199_v50 }
  0x44   : > { %348 = vmatprep.mubr.bf16.mxu0 %v3234_v2  ;;  %638 = vmatpush1.bf16.msra.mxu1 %v2975_v58 }
  0x4b   : > { %2537 = vmatmul.mubr.msk.bf16.gmra.mrb[28].mxu0 %vm221_vm0, %v200_v53 }
  0xe6   : > { %v280_v7 = vpop.f32.mrb[0].mxu0 }
  0xe7   : > { %v281_v8 = vadd.f32 %v280_v7, %v3438_v5  ;;  %v282_v9 = vpop.f32.mrb[1].mxu0 }
  0xe8   : > { %v283_v10 = vadd.f32 %v282_v9, %v3441_v6  ;;  %v284_v11 = vpop.f32.mrb[2].mxu0 }
  0xe9   : > { %v285_v12 = vadd.f32 %v284_v11, %v3438_v5  ;;  %v286_v13 = vpop.f32.mrb[3].mxu0  ;;  %v359_v15 = vmax.f32 %v281_v8, 0.0 }
  0xea   : > { %v287_v14 = vadd.f32 %v286_v13, %v3441_v6  ;;  %v360_v17 = vmax.f32 %v283_v10, 0.0 }
  0xeb   : > { %v361_v16 = vmax.f32 %v285_v12, 0.0 }
  0xec   : > { %v362_v18 = vmax.f32 %v287_v14, 0.0 }
  0xed   : > { %v391_v19 = vpack.c.bf16 %v361_v16, %v359_v15 }
  0xee   : > { %v290_v20 = vpop.f32.mrb[4].mxu0  ;;  %v392_v21 = vpack.c.bf16 %v362_v18, %v360_v17 }
  0xef   : > { %v291_v22 = vadd.f32 %v290_v20, %v3438_v5  ;;  %v292_v23 = vpop.f32.mrb[5].mxu0 }
  0xf0   : > { %v293_v24 = vadd.f32 %v292_v23, %v3441_v6  ;;  %v294_v25 = vpop.f32.mrb[6].mxu0  ;;  %639 = vmatprep.mubr.bf16.mxu1 %v392_v21 }
  0xf1   : > { %v295_v26 = vadd.f32 %v294_v25, %v3438_v5  ;;  %v296_v27 = vpop.f32.mrb[7].mxu0  ;;  %640 = vmatmul.mubr.bf16.vlgmr.msra.gmra.mrb[0].mxu1 %v391_v19  ;;  %v363_v29 = vmax.f32 %v291_v22, 0.0 }
  0xf2   : > { %v297_v28 = vadd.f32 %v296_v27, %v3441_v6  ;;  %v364_v31 = vmax.f32 %v293_v24, 0.0 }
  0xf3   : > { %v365_v30 = vmax.f32 %v295_v26, 0.0 }
  0xf4   : > { %v366_v32 = vmax.f32 %v297_v28, 0.0 }
  0xf5   : > { %v393_v33 = vpack.c.bf16 %v365_v30, %v363_v29 }
  0xf6   : > { %v394_v34 = vpack.c.bf16 %v366_v32, %v364_v31  ;;  %v300_v35 = vpop.f32.mrb[8].mxu0 }
  0xf7   : > { %v301_v36 = vadd.f32 %v300_v35, %v3438_v5  ;;  %v302_v37 = vpop.f32.mrb[9].mxu0 }
  0xf8   : > { %v303_v38 = vadd.f32 %v302_v37, %v3441_v6  ;;  %v304_v39 = vpop.f32.mrb[10].mxu0  ;;  %649 = vmatprep.mubr.bf16.mxu1 %v394_v34 }
  0xf9   : > { %v305_v40 = vadd.f32 %v304_v39, %v3438_v5  ;;  %v306_v41 = vpop.f32.mrb[11].mxu0  ;;  %650 = vmatmul.mubr.bf16.gmra.mrb[4].mxu1 %v393_v33  ;;  %v367_v43 = vmax.f32 %v301_v36, 0.0 }
  0xfa   : > { %v307_v42 = vadd.f32 %v306_v41, %v3441_v6  ;;  %v368_v45 = vmax.f32 %v303_v38, 0.0 }
  0xfb   : > { %v369_v44 = vmax.f32 %v305_v40, 0.0 }
  0xfc   : > { %v370_v46 = vmax.f32 %v307_v42, 0.0 }
  0xfd   : > { %v395_v47 = vpack.c.bf16 %v369_v44, %v367_v43 }
  0xfe   : > { %v396_v48 = vpack.c.bf16 %v370_v46, %v368_v45  ;;  %v310_v49 = vpop.f32.mrb[12].mxu0 }
  0xff   : > { %v311_v50 = vadd.f32 %v310_v49, %v3438_v5  ;;  %v312_v51 = vpop.f32.mrb[13].mxu0 }
 0x100   : > { %v313_v52 = vadd.f32 %v312_v51, %v3441_v6  ;;  %v314_v53 = vpop.f32.mrb[14].mxu0  ;;  %659 = vmatprep.mubr.bf16.mxu1 %v396_v48 }
 0x101   : > { %v315_v54 = vadd.f32 %v314_v53, %v3438_v5  ;;  %v316_v55 = vpop.f32.mrb[15].mxu0  ;;  %660 = vmatmul.mubr.bf16.gmra.mrb[8].mxu1 %v395_v47  ;;  %v371_v57 = vmax.f32 %v311_v50, 0.0 }
 0x102   : > { %v317_v56 = vadd.f32 %v316_v55, %v3441_v6  ;;  %v372_v59 = vmax.f32 %v313_v52, 0.0 }
 0x103   : > { %v373_v58 = vmax.f32 %v315_v54, 0.0 }
 0x104   : > { %v374_v60 = vmax.f32 %v317_v56, 0.0 }
 0x105   : > { %v397_v61 = vpack.c.bf16 %v373_v58, %v371_v57 }
 0x106   : > { %v398_v62 = vpack.c.bf16 %v374_v60, %v372_v59  ;;  %v320_v1 = vpop.f32.mrb[16].mxu0 }
 0x107   : > { %v321_v7 = vadd.f32 %v320_v1, %v3438_v5  ;;  %v322_v8 = vpop.f32.mrb[17].mxu0  ;;  %v2990_v1 = vld [vmem:[%s4238_s1 + $0x180] ss:$8 sps:$4 sm:$0xff]  }
 0x108   : > { %v323_v9 = vadd.f32 %v322_v8, %v3441_v6  ;;  %v324_v10 = vpop.f32.mrb[18].mxu0  ;;  %669 = vmatprep.mubr.bf16.mxu1 %v398_v62  ;;  %v2984_v62 = vld [vmem:[%s4238_s1 + $0x150] ss:$8 sps:$4 sm:$0xff]  }
 0x109   : > { %v325_v11 = vadd.f32 %v324_v10, %v3438_v5  ;;  %v326_v12 = vpop.f32.mrb[19].mxu0  ;;  %670 = vmatmul.mubr.bf16.gmra.mrb[12].mxu1 %v397_v61  ;;  %v375_v14 = vmax.f32 %v321_v7, 0.0  ;;  %2724 = vmatprep.subr.bf16.mxu0 %v2984_v62  ;;  %v3490_v7 = vld [vmem:[%s4238_s1 + $0x114] ss:$8 sps:$4 sm:$0xff]   ;;  %v3000_v8 = vld [vmem:[%s4238_s1 + $0x190] ss:$8 sps:$4 sm:$0xff]  }
 0x10a   : > { %v327_v13 = vadd.f32 %v326_v12, %v3441_v6  ;;  %v376_v16 = vmax.f32 %v323_v9, 0.0  ;;  %2725 = vmatpush3.bf16.msra.mxu0 %v2984_v62  ;;  %v3002_v9 = vld [vmem:[%s4238_s1 + $0x1a0] ss:$8 sps:$4 sm:$0xff]   ;;  %2780 = vmatprep.subr.bf16.mxu1 %v3000_v8  ;;  %v3004_v10 = vld [vmem:[%s4238_s1 + $0x1b0] ss:$8 sps:$4 sm:$0xff]  }
 0x10b   : > { %v377_v15 = vmax.f32 %v325_v11, 0.0  ;;  %2781 = vmatpush3.bf16.msra.mxu1 %v3000_v8  ;;  %v3006_v11 = vld [vmem:[%s4238_s1 + $0x1c0] ss:$8 sps:$4 sm:$0xff]   ;;  %v3008_v12 = vld [vmem:[%s4238_s1 + $0x1d0] ss:$8 sps:$4 sm:$0xff]  }
 0x10c   : > { %v378_v17 = vmax.f32 %v327_v13, 0.0  ;;  %2782 = vmatprep.subr.bf16.mxu1 %v3002_v9  ;;  %v441_v13 = vsub.s32 1, %v3424_v0 }
 0x10d   : > { %v399_v18 = vpack.c.bf16 %v377_v15, %v375_v14 }
 0x10e   : > { %v400_v19 = vpack.c.bf16 %v378_v17, %v376_v16  ;;  %v330_v20 = vpop.f32.mrb[20].mxu0  ;;  %v3510_v14 = vrot.slane %v3430_v3, %v441_v13  ;;  %v3513_v15 = vrot.slane %v3435_v4, %v441_v13 }
 0x10f   : > { %v331_v21 = vadd.f32 %v330_v20, %v3438_v5  ;;  %v332_v22 = vpop.f32.mrb[21].mxu0  ;;  %2783 = vmatpush3.bf16.msra.mxu1 %v3002_v9 }
 0x110   : > { %v333_v23 = vadd.f32 %v332_v22, %v3441_v6  ;;  %v334_v24 = vpop.f32.mrb[22].mxu0  ;;  %679 = vmatprep.mubr.bf16.mxu1 %v400_v19  ;;  %2784 = vmatprep.subr.bf16.mxu1 %v3004_v10 }
 0x111   : > { %v335_v25 = vadd.f32 %v334_v24, %v3438_v5  ;;  %v336_v26 = vpop.f32.mrb[23].mxu0  ;;  %680 = vmatmul.mubr.bf16.gmra.mrb[16].mxu1 %v399_v18  ;;  %v379_v28 = vmax.f32 %v331_v21, 0.0 }
 0x112   : > { %v337_v27 = vadd.f32 %v336_v26, %v3441_v6  ;;  %v380_v30 = vmax.f32 %v333_v23, 0.0 }
 0x113   : > { %v381_v29 = vmax.f32 %v335_v25, 0.0  ;;  %2785 = vmatpush3.bf16.msra.mxu1 %v3004_v10 }
 0x114   : > { %v382_v31 = vmax.f32 %v337_v27, 0.0  ;;  %2786 = vmatprep.subr.bf16.mxu1 %v3006_v11 }
 0x115   : > { %v401_v32 = vpack.c.bf16 %v381_v29, %v379_v28 }
 0x116   : > { %v402_v33 = vpack.c.bf16 %v382_v31, %v380_v30  ;;  %v340_v34 = vpop.f32.mrb[24].mxu0 }
 0x117   : > { %v341_v35 = vadd.f32 %v340_v34, %v3438_v5  ;;  %v342_v36 = vpop.f32.mrb[25].mxu0  ;;  %2787 = vmatpush3.bf16.msra.mxu1 %v3006_v11 }
 0x118   : > { %v343_v37 = vadd.f32 %v342_v36, %v3441_v6  ;;  %v344_v38 = vpop.f32.mrb[26].mxu0  ;;  %689 = vmatprep.mubr.bf16.mxu1 %v402_v33  ;;  %2788 = vmatprep.subr.bf16.mxu1 %v3008_v12 }
 0x119   : > { %v345_v39 = vadd.f32 %v344_v38, %v3438_v5  ;;  %v346_v40 = vpop.f32.mrb[27].mxu0  ;;  %690 = vmatmul.mubr.bf16.gmra.mrb[20].mxu1 %v401_v32  ;;  %v383_v42 = vmax.f32 %v341_v35, 0.0 }
 0x11a   : > { %v347_v41 = vadd.f32 %v346_v40, %v3441_v6  ;;  %v384_v44 = vmax.f32 %v343_v37, 0.0 }
 0x11b   : > { %v385_v43 = vmax.f32 %v345_v39, 0.0  ;;  %2789 = vmatpush3.bf16.msra.mxu1 %v3008_v12 }
 0x11c   : > { %v386_v45 = vmax.f32 %v347_v41, 0.0 }
 0x11d   : > { %v403_v46 = vpack.c.bf16 %v385_v43, %v383_v42 }
 0x11e   : > { %v404_v47 = vpack.c.bf16 %v386_v45, %v384_v44  ;;  %v350_v48 = vpop.f32.mrb[28].mxu0 }
 0x11f   : > { %v351_v49 = vadd.f32 %v350_v48, %v3438_v5  ;;  %v352_v50 = vpop.f32.mrb[29].mxu0 }
 0x120   : > { %v353_v51 = vadd.f32 %v352_v50, %v3441_v6  ;;  %v354_v52 = vpop.f32.mrb[30].mxu0  ;;  %699 = vmatprep.mubr.bf16.mxu1 %v404_v47 }
 0x121   : > { %v355_v53 = vadd.f32 %v354_v52, %v3438_v5  ;;  %v356_v54 = vpop.f32.mrb[31].mxu0  ;;  %700 = vmatmul.mubr.bf16.gmra.mrb[24].mxu1 %v403_v46  ;;  %v387_v56 = vmax.f32 %v351_v49, 0.0  ;;  %v2986_v5 = vld [vmem:[%s4238_s1 + $0x160] ss:$8 sps:$4 sm:$0xff]  }
 0x122   : > { %v357_v55 = vadd.f32 %v356_v54, %v3441_v6  ;;  %v388_v58 = vmax.f32 %v353_v51, 0.0  ;;  %2726 = vmatprep.subr.bf16.mxu0 %v2986_v5  ;;  %v2988_v6 = vld [vmem:[%s4238_s1 + $0x170] ss:$8 sps:$4 sm:$0xff]  }
 0x123   : > { %v389_v57 = vmax.f32 %v355_v53, 0.0  ;;  %2727 = vmatpush3.bf16.msra.mxu0 %v2986_v5 }
 0x124   : > { %v390_v59 = vmax.f32 %v357_v55, 0.0  ;;  %2728 = vmatprep.subr.bf16.mxu0 %v2988_v6 }
 0x125   : > { %v405_v60 = vpack.c.bf16 %v389_v57, %v387_v56  ;;  %v2993_v56 = vld [vmem:[%s4238_s1 + $0x124] ss:$8 sps:$4 sm:$0xff]  }
 0x126   : > { %v406_v61 = vpack.c.bf16 %v390_v59, %v388_v58 }
 0x127   : > { %2729 = vmatpush3.bf16.msra.mxu0 %v2988_v6  ;;  %v2994_v6 = vld [vmem:[%s4238_s1 + $0x134] ss:$8 sps:$4 sm:$0xff]  }
 0x128   : > { %709 = vmatprep.mubr.bf16.mxu1 %v406_v61  ;;  %2730 = vmatprep.subr.bf16.mxu0 %v2990_v1 }
 0x129   : > { %710 = vmatmul.mubr.bf16.gmra.mrb[28].mxu1 %v405_v60 }
 0x12b   : > { %2731 = vmatpush3.bf16.msra.mxu0 %v2990_v1 }
 0x12c   : > { %2748 = vmatprep.subr.bf16.mxu0 %v3490_v7 }
 0x1c4   : > { %v641_v16 = vpop.f32.mrb[0].mxu1 }
 0x1c5   : > { %v642_v17 = vadd.f32 %v641_v16, %v3510_v14  ;;  %v643_v18 = vpop.f32.mrb[1].mxu1 }
 0x1c6   : > { %v644_v19 = vadd.f32 %v643_v18, %v3513_v15  ;;  %v645_v20 = vpop.f32.mrb[2].mxu1 }
 0x1c7   : > { %v646_v21 = vadd.f32 %v645_v20, %v3510_v14  ;;  %v647_v22 = vpop.f32.mrb[3].mxu1  ;;  %3048 = vtanh.f32 %v642_v17 }
 0x1c8   : > { %v648_v23 = vadd.f32 %v647_v22, %v3513_v15  ;;  %v736_v24 = vmax.f32 %v644_v19, 0.0 }
 0x1c9   : > { %3050 = vtanh.f32 %v646_v21 }
 0x1ca   : > { %v737_v25 = vmax.f32 %v648_v23, 0.0  ;;  %v2996_v23 = vld [vmem:[%s4238_s1 + $0x154] ss:$8 sps:$4 sm:$0xff]  }
 0x1cc   : > { %v3519_v26 = vpack.c.bf16 %v737_v25, %v736_v24  ;;  %v651_v27 = vpop.f32.mrb[4].mxu1 }
 0x1cd   : > { %v652_v28 = vadd.f32 %v651_v27, %v3510_v14  ;;  %v653_v29 = vpop.f32.mrb[5].mxu1 }
 0x1ce   : > { %v654_v30 = vadd.f32 %v653_v29, %v3513_v15  ;;  %v655_v31 = vpop.f32.mrb[6].mxu1 }
 0x1cf   : > { %v656_v32 = vadd.f32 %v655_v31, %v3510_v14  ;;  %v657_v33 = vpop.f32.mrb[7].mxu1  ;;  %3052 = vtanh.f32 %v652_v28 }
 0x1d0   : > { %v658_v34 = vadd.f32 %v657_v33, %v3513_v15  ;;  %v738_v36 = vmax.f32 %v654_v30, 0.0 }
 0x1d1   : > { %3054 = vtanh.f32 %v656_v32  ;;  %v3049_v35 = vpop.eup %3048  ;;  %v2997_v32 = vld [vmem:[%s4238_s1 + $0x164] ss:$8 sps:$4 sm:$0xff]  }
 0x1d2   : > { %v739_v37 = vmax.f32 %v658_v34, 0.0 }
 0x1d3   : > { %v3051_v38 = vpop.eup %3050 }
 0x1d4   : > { %v3525_v39 = vpack.c.bf16 %v739_v37, %v738_v36  ;;  %v661_v40 = vpop.f32.mrb[8].mxu1  ;;  %v768_v41 = vpack.c.bf16 %v3051_v38, %v3049_v35 }
 0x1d5   : > { %v662_v42 = vadd.f32 %v661_v40, %v3510_v14  ;;  %v663_v43 = vpop.f32.mrb[9].mxu1 }
 0x1d6   : > { %v664_v44 = vadd.f32 %v663_v43, %v3513_v15  ;;  %v665_v45 = vpop.f32.mrb[10].mxu1  ;;  %2732 = vmatprep.mubr.bf16.mxu0 %v768_v41  ;;  %v2998_v41 = vld [vmem:[%s4238_s1 + $0x174] ss:$8 sps:$4 sm:$0xff]  }
 0x1d7   : > { %v666_v46 = vadd.f32 %v665_v45, %v3510_v14  ;;  %v667_v47 = vpop.f32.mrb[11].mxu1  ;;  %3056 = vtanh.f32 %v662_v42 }
 0x1d8   : > { %v668_v48 = vadd.f32 %v667_v47, %v3513_v15  ;;  %v740_v50 = vmax.f32 %v664_v44, 0.0 }
 0x1d9   : > { %3058 = vtanh.f32 %v666_v46  ;;  %v3053_v49 = vpop.eup %3052 }
 0x1da   : > { %v741_v51 = vmax.f32 %v668_v48, 0.0 }
 0x1db   : > { %v3055_v52 = vpop.eup %3054 }
 0x1dc   : > { %v3531_v53 = vpack.c.bf16 %v741_v51, %v740_v50  ;;  %v671_v54 = vpop.f32.mrb[12].mxu1  ;;  %v769_v55 = vpack.c.bf16 %v3055_v52, %v3053_v49  ;;  %v2999_v49 = vld [vmem:[%s4238_s1 + $0x184] ss:$8 sps:$4 sm:$0xff]  }
 0x1dd   : > { %v672_v57 = vadd.f32 %v671_v54, %v3510_v14  ;;  %v673_v58 = vpop.f32.mrb[13].mxu1 }
 0x1de   : > { %v674_v59 = vadd.f32 %v673_v58, %v3513_v15  ;;  %v675_v60 = vpop.f32.mrb[14].mxu1  ;;  %2733 = vmatmul.mubr.bf16.vlgmr.msra.gmra.mrb[32].mxu0 %v769_v55 }
 0x1df   : > { %v676_v61 = vadd.f32 %v675_v60, %v3510_v14  ;;  %v677_v62 = vpop.f32.mrb[15].mxu1  ;;  %2749 = vmatpush3.bf16.msra.mxu0 %v3490_v7  ;;  %3060 = vtanh.f32 %v672_v57  ;;  %v2995_v7 = vld [vmem:[%s4238_s1 + $0x144] ss:$8 sps:$4 sm:$0xff]  }
 0x1e0   : > { %v678_v5 = vadd.f32 %v677_v62, %v3513_v15  ;;  %2750 = vmatprep.subr.bf16.mxu0 %v2993_v56  ;;  %v742_v8 = vmax.f32 %v674_v59, 0.0 }
 0x1e1   : > { %3062 = vtanh.f32 %v676_v61  ;;  %v3057_v1 = vpop.eup %3056 }
 0x1e2   : > { %v743_v9 = vmax.f32 %v678_v5, 0.0 }
 0x1e3   : > { %v3059_v10 = vpop.eup %3058  ;;  %2751 = vmatpush3.bf16.msra.mxu0 %v2993_v56 }
 0x1e4   : > { %v3544_v11 = vpack.c.bf16 %v743_v9, %v742_v8  ;;  %v681_v12 = vpop.f32.mrb[16].mxu1  ;;  %v770_v13 = vpack.c.bf16 %v3059_v10, %v3057_v1  ;;  %2752 = vmatprep.subr.bf16.mxu0 %v2994_v6 }
 0x1e5   : > { %v682_v16 = vadd.f32 %v681_v12, %v3510_v14  ;;  %v683_v17 = vpop.f32.mrb[17].mxu1 }
 0x1e6   : > { %v684_v18 = vadd.f32 %v683_v17, %v3513_v15  ;;  %v685_v19 = vpop.f32.mrb[18].mxu1  ;;  %2736 = vmatprep.mubr.bf16.mxu0 %v770_v13 }
 0x1e7   : > { %v686_v20 = vadd.f32 %v685_v19, %v3510_v14  ;;  %v687_v21 = vpop.f32.mrb[19].mxu1  ;;  %2753 = vmatpush3.bf16.msra.mxu0 %v2994_v6  ;;  %3064 = vtanh.f32 %v682_v16 }
 0x1e8   : > { %v688_v22 = vadd.f32 %v687_v21, %v3513_v15  ;;  %2754 = vmatprep.subr.bf16.mxu0 %v2995_v7  ;;  %v744_v25 = vmax.f32 %v684_v18, 0.0 }
 0x1e9   : > { %3066 = vtanh.f32 %v686_v20  ;;  %v3061_v24 = vpop.eup %3060 }
 0x1ea   : > { %v745_v27 = vmax.f32 %v688_v22, 0.0 }
 0x1eb   : > { %v3063_v28 = vpop.eup %3062  ;;  %2755 = vmatpush3.bf16.msra.mxu0 %v2995_v7 }
 0x1ec   : > { %v3556_v29 = vpack.c.bf16 %v745_v27, %v744_v25  ;;  %v691_v30 = vpop.f32.mrb[20].mxu1  ;;  %v771_v31 = vpack.c.bf16 %v3063_v28, %v3061_v24  ;;  %2756 = vmatprep.subr.bf16.mxu0 %v2996_v23  ;;  %v3019_v25 = vld [vmem:[%s4238_s1 + $0x1c4] ss:$8 sps:$4 sm:$0xff]   ;;  %v3020_v27 = vld [vmem:[%s4238_s1 + $0x1d4] ss:$8 sps:$4 sm:$0xff]  }
 0x1ed   : > { %v692_v33 = vadd.f32 %v691_v30, %v3510_v14  ;;  %v693_v34 = vpop.f32.mrb[21].mxu1  ;;  %v3021_v28 = vld [vmem:[%s4238_s1 + $0x1e4] ss:$8 sps:$4 sm:$0xff]  }
 0x1ee   : > { %v694_v35 = vadd.f32 %v693_v34, %v3513_v15  ;;  %v695_v36 = vpop.f32.mrb[22].mxu1  ;;  %2737 = vmatmul.mubr.bf16.gmra.mrb[36].mxu0 %v771_v31  ;;  %v3023_v30 = vld [vmem:[%s4238_s1 + $0x204] ss:$8 sps:$4 sm:$0xff]   ;;  %v3024_v31 = vld [vmem:[%s4238_s1 + $0x210] ss:$8 sps:$4 sm:$0xff]  }
 0x1ef   : > { %v696_v37 = vadd.f32 %v695_v36, %v3510_v14  ;;  %v697_v38 = vpop.f32.mrb[23].mxu1  ;;  %2757 = vmatpush3.bf16.msra.mxu0 %v2996_v23  ;;  %3068 = vtanh.f32 %v692_v33 }
 0x1f0   : > { %v698_v40 = vadd.f32 %v697_v38, %v3513_v15  ;;  %2758 = vmatprep.subr.bf16.mxu0 %v2997_v32  ;;  %v746_v43 = vmax.f32 %v694_v35, 0.0 }
 0x1f1   : > { %3070 = vtanh.f32 %v696_v37  ;;  %v3065_v42 = vpop.eup %3064 }
 0x1f2   : > { %v747_v44 = vmax.f32 %v698_v40, 0.0 }
 0x1f3   : > { %v3067_v45 = vpop.eup %3066  ;;  %2759 = vmatpush3.bf16.msra.mxu0 %v2997_v32  ;;  %v778_v32 = vsub.s32 2, %v3424_v0 }
 0x1f4   : > { %v946_v46 = vpack.c.bf16 %v747_v44, %v746_v43  ;;  %v701_v47 = vpop.f32.mrb[24].mxu1  ;;  %v772_v48 = vpack.c.bf16 %v3067_v45, %v3065_v42  ;;  %2760 = vmatprep.subr.bf16.mxu0 %v2998_v41 }
 0x1f5   : > { %v702_v50 = vadd.f32 %v701_v47, %v3510_v14  ;;  %v703_v51 = vpop.f32.mrb[25].mxu1  ;;  %v3624_v33 = vrot.slane %v3430_v3, %v778_v32 }
 0x1f6   : > { %v704_v52 = vadd.f32 %v703_v51, %v3513_v15  ;;  %v705_v54 = vpop.f32.mrb[26].mxu1  ;;  %2740 = vmatprep.mubr.bf16.mxu0 %v772_v48 }
 0x1f7   : > { %v706_v55 = vadd.f32 %v705_v54, %v3510_v14  ;;  %v707_v56 = vpop.f32.mrb[27].mxu1  ;;  %2761 = vmatpush3.bf16.msra.mxu0 %v2998_v41  ;;  %3072 = vtanh.f32 %v702_v50  ;;  %v3026_v54 = vld [vmem:[%s4238_s1 + $0x220] ss:$8 sps:$4 sm:$0xff]  }
 0x1f8   : > { %v708_v57 = vadd.f32 %v707_v56, %v3513_v15  ;;  %2762 = vmatprep.subr.bf16.mxu0 %v2999_v49  ;;  %v748_v59 = vmax.f32 %v704_v52, 0.0 }
 0x1f9   : > { %3074 = vtanh.f32 %v706_v55  ;;  %v3069_v58 = vpop.eup %3068 }
 0x1fa   : > { %v749_v60 = vmax.f32 %v708_v57, 0.0 }
 0x1fb   : > { %v3071_v61 = vpop.eup %3070  ;;  %2763 = vmatpush3.bf16.msra.mxu0 %v2999_v49 }
 0x1fc   : > { %v947_v62 = vpack.c.bf16 %v749_v60, %v748_v59  ;;  %v711_v5 = vpop.f32.mrb[28].mxu1  ;;  %v773_v6 = vpack.c.bf16 %v3071_v61, %v3069_v58  ;;  %v3028_v58 = vld [vmem:[%s4238_s1 + $0x230] ss:$8 sps:$4 sm:$0xff]  }
 0x1fd   : > { %v712_v1 = vadd.f32 %v711_v5, %v3510_v14  ;;  %v713_v8 = vpop.f32.mrb[29].mxu1 }
 0x1fe   : > { %v714_v9 = vadd.f32 %v713_v8, %v3513_v15  ;;  %v715_v10 = vpop.f32.mrb[30].mxu1  ;;  %2741 = vmatmul.mubr.bf16.gmra.mrb[40].mxu0 %v773_v6 }
 0x1ff   : > { %v716_v12 = vadd.f32 %v715_v10, %v3510_v14  ;;  %v717_v13 = vpop.f32.mrb[31].mxu1  ;;  %3076 = vtanh.f32 %v712_v1  ;;  %v3010_v14 = vld [vmem:[%s4238_s1 + $0x1e0] ss:$8 sps:$4 sm:$0xff]  }
 0x200   : > { %v718_v7 = vadd.f32 %v717_v13, %v3513_v15  ;;  %v750_v17 = vmax.f32 %v714_v9, 0.0  ;;  %v3012_v15 = vld [vmem:[%s4238_s1 + $0x1f0] ss:$8 sps:$4 sm:$0xff]   ;;  %2790 = vmatprep.subr.bf16.mxu1 %v3010_v14 }
 0x201   : > { %3078 = vtanh.f32 %v716_v12  ;;  %v3073_v16 = vpop.eup %3072  ;;  %2791 = vmatpush3.bf16.msra.mxu1 %v3010_v14 }
 0x202   : > { %v751_v18 = vmax.f32 %v718_v7, 0.0  ;;  %2792 = vmatprep.subr.bf16.mxu1 %v3012_v15 }
 0x203   : > { %v3075_v19 = vpop.eup %3074 }
 0x204   : > { %v948_v20 = vpack.c.bf16 %v751_v18, %v750_v17  ;;  %v774_v21 = vpack.c.bf16 %v3075_v19, %v3073_v16 }
 0x205   : > { %2793 = vmatpush3.bf16.msra.mxu1 %v3012_v15 }
 0x206   : > { %2744 = vmatprep.mubr.bf16.mxu0 %v774_v21 }
 0x209   : > { %v3077_v22 = vpop.eup %3076 }
 0x20b   : > { %v3079_v23 = vpop.eup %3078 }
 0x20c   : > { %v775_v24 = vpack.c.bf16 %v3079_v23, %v3077_v22 }
 0x20e   : > { %2745 = vmatmul.mubr.bf16.gmra.mrb[44].mxu0 %v775_v24 }
 0x20f   : > { %2764 = vmatprep.mubr.bf16.mxu0 %v3519_v26  ;;  %v3014_v26 = vld [vmem:[%s4238_s1 + $0x200] ss:$8 sps:$4 sm:$0xff]  }
 0x210   : > { %2794 = vmatprep.subr.bf16.mxu1 %v3014_v26 }
 0x211   : > { %2795 = vmatpush3.bf16.msra.mxu1 %v3014_v26 }
 0x212   : > { %2844 = vmatprep.subr.bf16.mxu1 %v3024_v31 }
 0x216   : > { %2765 = vmatmul.mubr.bf16.vlgmr.msra.gmra.mrb[48].mxu0 %v3525_v39  ;;  %v3016_v39 = vld [vmem:[%s4238_s1 + $0x194] ss:$8 sps:$4 sm:$0xff]  }
 0x217   : > { %2768 = vmatprep.mubr.bf16.mxu0 %v3531_v53  ;;  %2812 = vmatprep.subr.bf16.mxu0 %v3016_v39  ;;  %v3017_v53 = vld [vmem:[%s4238_s1 + $0x1a4] ss:$8 sps:$4 sm:$0xff]  }
 0x218   : > { %2813 = vmatpush3.bf16.msra.mxu0 %v3016_v39 }
 0x219   : > { %2814 = vmatprep.subr.bf16.mxu0 %v3017_v53 }
 0x21c   : > { %2815 = vmatpush3.bf16.msra.mxu0 %v3017_v53 }
 0x21e   : > { %2769 = vmatmul.mubr.bf16.gmra.mrb[52].mxu0 %v3544_v11  ;;  %v3018_v11 = vld [vmem:[%s4238_s1 + $0x1b4] ss:$8 sps:$4 sm:$0xff]  }
 0x21f   : > { %2772 = vmatprep.mubr.bf16.mxu0 %v3556_v29  ;;  %2816 = vmatprep.subr.bf16.mxu0 %v3018_v11  ;;  %v3022_v29 = vld [vmem:[%s4238_s1 + $0x1f4] ss:$8 sps:$4 sm:$0xff]  }
 0x220   : > { %2817 = vmatpush3.bf16.msra.mxu0 %v3018_v11 }
 0x221   : > { %2818 = vmatprep.subr.bf16.mxu0 %v3019_v25 }
 0x224   : > { %2819 = vmatpush3.bf16.msra.mxu0 %v3019_v25  ;;  %v3651_v25 = vrot.slane %v3435_v4, %v778_v32 }
 0x225   : > { %2820 = vmatprep.subr.bf16.mxu0 %v3020_v27 }
 0x226   : > { %2773 = vmatmul.mubr.bf16.gmra.mrb[56].mxu0 %v946_v46 }
 0x227   : > { %2776 = vmatprep.mubr.bf16.mxu0 %v947_v62 }
 0x228   : > { %2821 = vmatpush3.bf16.msra.mxu0 %v3020_v27 }
 0x229   : > { %2822 = vmatprep.subr.bf16.mxu0 %v3021_v28 }
 0x22c   : > { %2823 = vmatpush3.bf16.msra.mxu0 %v3021_v28 }
 0x22d   : > { %2824 = vmatprep.subr.bf16.mxu0 %v3022_v29 }
 0x22e   : > { %2777 = vmatmul.mubr.bf16.gmra.mrb[60].mxu0 %v948_v20 }
 0x230   : > { %2825 = vmatpush3.bf16.msra.mxu0 %v3022_v29 }
 0x231   : > { %2826 = vmatprep.subr.bf16.mxu0 %v3023_v30 }
 0x234   : > { %2827 = vmatpush3.bf16.msra.mxu0 %v3023_v30 }
 0x2b1   : > { %v2734_v34 = vpop.f32.mrb[32].mxu0 }
 0x2b2   : > { %v871_v35 = vadd.f32 %v2734_v34, %v3624_v33  ;;  %v862_v36 = vpop.f32.mrb[33].mxu0 }
 0x2b3   : > { %v863_v37 = vadd.f32 %v862_v36, %v3624_v33  ;;  %v2735_v38 = vpop.f32.mrb[34].mxu0 }
 0x2b4   : > { %3080 = vtanh.f32 %v871_v35  ;;  %v874_v40 = vadd.f32 %v2735_v38, %v3624_v33  ;;  %v865_v41 = vpop.f32.mrb[35].mxu0 }
 0x2b5   : > { %3082 = vtanh.f32 %v863_v37  ;;  %v866_v42 = vadd.f32 %v865_v41, %v3624_v33 }
 0x2b6   : > { %3084 = vtanh.f32 %v874_v40 }
 0x2b7   : > { %3086 = vtanh.f32 %v866_v42 }
 0x2be   : > { %v3081_v43 = vpop.eup %3080 }
 0x2bf   : > { %v3083_v44 = vpop.eup %3082 }
 0x2c0   : > { %v3085_v3 = vpop.eup %3084 }
 0x2c1   : > { %v3087_v45 = vpop.eup %3086  ;;  %v2738_v46 = vpop.f32.mrb[36].mxu0  ;;  %v1115_v47 = vpack.c.bf16 %v3085_v3, %v3081_v43 }
 0x2c2   : > { %v887_v48 = vadd.f32 %v2738_v46, %v3624_v33  ;;  %v878_v49 = vpop.f32.mrb[37].mxu0  ;;  %v1114_v50 = vpack.c.bf16 %v3087_v45, %v3083_v44 }
 0x2c3   : > { %v879_v51 = vadd.f32 %v878_v49, %v3624_v33  ;;  %v2739_v52 = vpop.f32.mrb[38].mxu0 }
 0x2c4   : > { %3088 = vtanh.f32 %v887_v48  ;;  %v890_v55 = vadd.f32 %v2739_v52, %v3624_v33  ;;  %v881_v56 = vpop.f32.mrb[39].mxu0  ;;  %2796 = vmatprep.mubr.bf16.mxu1 %v1114_v50 }
 0x2c5   : > { %3090 = vtanh.f32 %v879_v51  ;;  %v882_v57 = vadd.f32 %v881_v56, %v3624_v33  ;;  %2797 = vmatmul.mubr.bf16.vlgmr.msra.gmra.mrb[32].mxu1 %v1115_v47 }
 0x2c6   : > { %3092 = vtanh.f32 %v890_v55  ;;  %2845 = vmatpush3.bf16.msra.mxu1 %v3024_v31 }
 0x2c7   : > { %3094 = vtanh.f32 %v882_v57  ;;  %2846 = vmatprep.subr.bf16.mxu1 %v3026_v54 }
 0x2ca   : > { %2847 = vmatpush3.bf16.msra.mxu1 %v3026_v54 }
 0x2cb   : > { %2848 = vmatprep.subr.bf16.mxu1 %v3028_v58 }
 0x2ce   : > { %v3089_v59 = vpop.eup %3088  ;;  %2849 = vmatpush3.bf16.msra.mxu1 %v3028_v58 }
 0x2cf   : > { %v3091_v60 = vpop.eup %3090 }
 0x2d0   : > { %v3093_v61 = vpop.eup %3092 }
 0x2d1   : > { %v3095_v62 = vpop.eup %3094  ;;  %v2742_v5 = vpop.f32.mrb[40].mxu0  ;;  %v1117_v6 = vpack.c.bf16 %v3093_v61, %v3089_v59 }
 0x2d2   : > { %v903_v1 = vadd.f32 %v2742_v5, %v3624_v33  ;;  %v894_v8 = vpop.f32.mrb[41].mxu0  ;;  %v1116_v9 = vpack.c.bf16 %v3095_v62, %v3091_v60 }
 0x2d3   : > { %v895_v10 = vadd.f32 %v894_v8, %v3624_v33  ;;  %v2743_v12 = vpop.f32.mrb[42].mxu0 }
 0x2d4   : > { %3096 = vtanh.f32 %v903_v1  ;;  %v906_v13 = vadd.f32 %v2743_v12, %v3624_v33  ;;  %v897_v7 = vpop.f32.mrb[43].mxu0  ;;  %2800 = vmatprep.mubr.bf16.mxu1 %v1116_v9 }
 0x2d5   : > { %3098 = vtanh.f32 %v895_v10  ;;  %v898_v16 = vadd.f32 %v897_v7, %v3624_v33  ;;  %2801 = vmatmul.mubr.bf16.gmra.mrb[36].mxu1 %v1117_v6 }
 0x2d6   : > { %3100 = vtanh.f32 %v906_v13 }
 0x2d7   : > { %3102 = vtanh.f32 %v898_v16 }
 0x2de   : > { %v3097_v17 = vpop.eup %3096 }
 0x2df   : > { %v3099_v18 = vpop.eup %3098 }
 0x2e0   : > { %v3101_v19 = vpop.eup %3100 }
 0x2e1   : > { %v3103_v20 = vpop.eup %3102  ;;  %v2746_v21 = vpop.f32.mrb[44].mxu0  ;;  %v1119_v22 = vpack.c.bf16 %v3101_v19, %v3097_v17 }
 0x2e2   : > { %v919_v23 = vadd.f32 %v2746_v21, %v3624_v33  ;;  %v910_v24 = vpop.f32.mrb[45].mxu0  ;;  %v1118_v14 = vpack.c.bf16 %v3103_v20, %v3099_v18 }
 0x2e3   : > { %v911_v15 = vadd.f32 %v910_v24, %v3624_v33  ;;  %v2747_v26 = vpop.f32.mrb[46].mxu0 }
 0x2e4   : > { %3104 = vtanh.f32 %v919_v23  ;;  %v922_v39 = vadd.f32 %v2747_v26, %v3624_v33  ;;  %v913_v53 = vpop.f32.mrb[47].mxu0  ;;  %2804 = vmatprep.mubr.bf16.mxu1 %v1118_v14 }
 0x2e5   : > { %3106 = vtanh.f32 %v911_v15  ;;  %v914_v11 = vadd.f32 %v913_v53, %v3624_v33  ;;  %2805 = vmatmul.mubr.bf16.gmra.mrb[40].mxu1 %v1119_v22 }
 0x2e6   : > { %3108 = vtanh.f32 %v922_v39 }
 0x2e7   : > { %3110 = vtanh.f32 %v914_v11 }
 0x2e9   : > { %v2766_v27 = vpop.f32.mrb[48].mxu0 }
 0x2ea   : > { %v1028_v28 = vadd.f32 %v2766_v27, %v3651_v25  ;;  %v1019_v29 = vpop.f32.mrb[49].mxu0 }
 0x2eb   : > { %v1020_v30 = vadd.f32 %v1019_v29, %v3651_v25  ;;  %v2767_v31 = vpop.f32.mrb[50].mxu0  ;;  %v3030_v29 = vld [vmem:[%s4238_s1 + $0x240] ss:$8 sps:$4 sm:$0xff]  }
 0x2ec   : > { %v1031_v34 = vadd.f32 %v2767_v31, %v3651_v25  ;;  %v1022_v35 = vpop.f32.mrb[51].mxu0  ;;  %v1084_v37 = vmax.f32 %v1028_v28, 0.0  ;;  %2850 = vmatprep.subr.bf16.mxu1 %v3030_v29  ;;  %v3036_v31 = vld [vmem:[%s4238_s1 + $0x270] ss:$8 sps:$4 sm:$0xff]  }
 0x2ed   : > { %v1023_v33 = vadd.f32 %v1022_v35, %v3651_v25  ;;  %v1082_v41 = vmax.f32 %v1020_v30, 0.0  ;;  %2851 = vmatpush3.bf16.msra.mxu1 %v3030_v29  ;;  %v3032_v30 = vld [vmem:[%s4238_s1 + $0x250] ss:$8 sps:$4 sm:$0xff]   ;;  %v3040_v35 = vld [vmem:[%s4238_s1 + $0x214] ss:$8 sps:$4 sm:$0xff]  }
 0x2ee   : > { %v3105_v36 = vpop.eup %3104  ;;  %v1085_v38 = vmax.f32 %v1031_v34, 0.0  ;;  %2852 = vmatprep.subr.bf16.mxu1 %v3032_v30  ;;  %v3038_v34 = vld [vmem:[%s4238_s1 + $0x280] ss:$8 sps:$4 sm:$0xff]   ;;  %2876 = vmatprep.subr.bf16.mxu0 %v3040_v35 }
 0x2ef   : > { %v3107_v40 = vpop.eup %3106  ;;  %v1083_v4 = vmax.f32 %v1023_v33, 0.0  ;;  %v3041_v33 = vld [vmem:[%s4238_s1 + $0x224] ss:$8 sps:$4 sm:$0xff]  }
 0x2f0   : > { %v3109_v32 = vpop.eup %3108  ;;  %v1288_v42 = vpack.c.bf16 %v1085_v38, %v1084_v37  ;;  %v3043_v37 = vld [vmem:[%s4238_s1 + $0x244] ss:$8 sps:$4 sm:$0xff]   ;;  %v3044_v38 = vld [vmem:[%s4238_s1 + $0x254] ss:$8 sps:$4 sm:$0xff]  }
 0x2f1   : > { %v3111_v43 = vpop.eup %3110  ;;  %v1287_v44 = vpack.c.bf16 %v1083_v4, %v1082_v41  ;;  %v2770_v3 = vpop.f32.mrb[52].mxu0  ;;  %v1121_v45 = vpack.c.bf16 %v3109_v32, %v3105_v36  ;;  %2853 = vmatpush3.bf16.msra.mxu1 %v3032_v30  ;;  %v3042_v36 = vld [vmem:[%s4238_s1 + $0x234] ss:$8 sps:$4 sm:$0xff]   ;;  %v3047_v4 = vld [vmem:[%s4238_s1 + $0x284] ss:$8 sps:$4 sm:$0xff]  }
 0x2f2   : > { %v1044_v46 = vadd.f32 %v2770_v3, %v3651_v25  ;;  %v1035_v47 = vpop.f32.mrb[53].mxu0  ;;  %v1120_v48 = vpack.c.bf16 %v3111_v43, %v3107_v40  ;;  %v3045_v40 = vld [vmem:[%s4238_s1 + $0x264] ss:$8 sps:$4 sm:$0xff]   ;;  %v3046_v41 = vld [vmem:[%s4238_s1 + $0x274] ss:$8 sps:$4 sm:$0xff]  }
 0x2f3   : > { %v1036_v49 = vadd.f32 %v1035_v47, %v3651_v25  ;;  %v2771_v50 = vpop.f32.mrb[54].mxu0  ;;  %2828 = vmatprep.mubr.bf16.mxu0 %v1287_v44  ;;  %v3208_v32 = vld [vmem:[%s3294_s30 + $0x8] sm:$0xff]  ;;  %v3210_v43 = vld [vmem:[%s3294_s30 + $0x10] sm:$0xff]  ;;  %v3211_v44 = vld [vmem:[%s3294_s30 + $0x20] sm:$0xff] }
 0x2f4   : > { %v1047_v51 = vadd.f32 %v2771_v50, %v3651_v25  ;;  %v1038_v52 = vpop.f32.mrb[55].mxu0  ;;  %2808 = vmatprep.mubr.bf16.mxu1 %v1120_v48  ;;  %2829 = vmatmul.mubr.bf16.vlgmr.msra.gmra.mrb[64].mxu0 %v1288_v42  ;;  %v1088_v55 = vmax.f32 %v1044_v46, 0.0  ;;  %v3209_v42 = vld [vmem:[%s3294_s30] sm:$0xff]  ;;  %v3212_v3 = vld [vmem:[%s3294_s30 + $0x18] sm:$0xff]  ;;  %v3214_v46 = vld [vmem:[%s3294_s30 + $0x28] sm:$0xff] }
 0x2f5   : > { %v1039_v54 = vadd.f32 %v1038_v52, %v3651_v25  ;;  %2809 = vmatmul.mubr.bf16.gmra.mrb[44].mxu1 %v1121_v45  ;;  %v1086_v57 = vmax.f32 %v1036_v49, 0.0  ;;  %2877 = vmatpush3.bf16.msra.mxu0 %v3040_v35  ;;  %v3213_v45 = vld [vmem:[%s3294_s30 + $0x30] sm:$0xff]  ;;  %v3215_v47 = vld [vmem:[%s3294_s30 + $0x40] sm:$0xff]  ;;  %v3216_v48 = vld [vmem:[%s3294_s30 + $0x38] sm:$0xff] }
 0x2f6   : > { %v1089_v56 = vmax.f32 %v1047_v51, 0.0  ;;  %2878 = vmatprep.subr.bf16.mxu0 %v3041_v33  ;;  %2012 = vrot.lane.b32.xlu1 %v3208_v32, %s3235_s24  ;;  %v3217_v49 = vld [vmem:[%s3294_s30 + $0x50] sm:$0xff]  ;;  %v3218_v50 = vld [vmem:[%s3294_s30 + $0x48] sm:$0xff]  ;;  %v3219_v51 = vld [vmem:[%s3294_s30 + $0x60] sm:$0xff] }
 0x2f7   : > { %v1087_v58 = vmax.f32 %v1039_v54, 0.0  ;;  %2010 = vrot.lane.b32.xlu0 %v3209_v42, %s3235_s24  ;;  %v3220_v52 = vld [vmem:[%s3294_s30 + $0x58] sm:$0xff]  ;;  %v3221_v54 = vld [vmem:[%s3294_s30 + $0x70] sm:$0xff] }
 0x2f8   : > { %v1290_v59 = vpack.c.bf16 %v1089_v56, %v1088_v55  ;;  %v3222_v55 = vld [vmem:[%s3294_s30 + $0x68] sm:$0xff]  ;;  %v3223_v56 = vld [vmem:[%s3294_s30 + $0x78] sm:$0xff] }
 0x2f9   : > { %v1289_v60 = vpack.c.bf16 %v1087_v58, %v1086_v57  ;;  %v2774_v61 = vpop.f32.mrb[56].mxu0  ;;  %2879 = vmatpush3.bf16.msra.mxu0 %v3041_v33  ;;  %v1124_v57 = vsub.s32 3, %v3424_v0  ;;  %v3744_v58 = vld [vmem:[%s4239_s2] sm:$0xff] }
 0x2fa   : > { %v1060_v62 = vadd.f32 %v2774_v61, %v3651_v25  ;;  %v1051_v5 = vpop.f32.mrb[57].mxu0  ;;  %2880 = vmatprep.subr.bf16.mxu0 %v3042_v36  ;;  %2014 = vrot.lane.b32.xlu1 %v3210_v43, %s3235_s24 }
 0x2fb   : > { %v1052_v6 = vadd.f32 %v1051_v5, %v3651_v25  ;;  %v2775_v1 = vpop.f32.mrb[58].mxu0  ;;  %2832 = vmatprep.mubr.bf16.mxu0 %v1289_v60  ;;  %2018 = vrot.lane.b32.xlu0 %v3211_v44, %s3235_s24 }
 0x2fc   : > { %v1063_v8 = vadd.f32 %v2775_v1, %v3651_v25  ;;  %v1054_v9 = vpop.f32.mrb[59].mxu0  ;;  %2833 = vmatmul.mubr.bf16.gmra.mrb[68].mxu0 %v1290_v59  ;;  %v1092_v12 = vmax.f32 %v1060_v62, 0.0  ;;  %v3747_v59 = vrot.slane %v3744_v58, %v1124_v57 }
 0x2fd   : > { %v1055_v10 = vadd.f32 %v1054_v9, %v3651_v25  ;;  %v1090_v7 = vmax.f32 %v1052_v6, 0.0  ;;  %2881 = vmatpush3.bf16.msra.mxu0 %v3042_v36  ;;  %v3764_v36 = vld [vmem:[%s4239_s2 + $0x8] sm:$0xff] }
 0x2fe   : > { %v1093_v13 = vmax.f32 %v1063_v8, 0.0  ;;  %2882 = vmatprep.subr.bf16.mxu0 %v3043_v37  ;;  %2016 = vrot.lane.b32.xlu1 %v3212_v3, %s3235_s24 }
 0x2ff   : > { %v1091_v16 = vmax.f32 %v1055_v10, 0.0  ;;  %2022 = vrot.lane.b32.xlu0 %v3213_v45, %s3235_s24 }
 0x300   : > { %v1292_v17 = vpack.c.bf16 %v1093_v13, %v1092_v12 }
 0x301   : > { %v1291_v18 = vpack.c.bf16 %v1091_v16, %v1090_v7  ;;  %v2778_v19 = vpop.f32.mrb[60].mxu0  ;;  %2883 = vmatpush3.bf16.msra.mxu0 %v3043_v37  ;;  %v3767_v37 = vrot.slane %v3764_v36, %v1124_v57 }
 0x302   : > { %v1076_v20 = vadd.f32 %v2778_v19, %v3651_v25  ;;  %v1067_v21 = vpop.f32.mrb[61].mxu0  ;;  %2884 = vmatprep.subr.bf16.mxu0 %v3044_v38  ;;  %2020 = vrot.lane.b32.xlu1 %v3214_v46, %s3235_s24 }
 0x303   : > { %v1068_v22 = vadd.f32 %v1067_v21, %v3651_v25  ;;  %v2779_v23 = vpop.f32.mrb[62].mxu0  ;;  %2836 = vmatprep.mubr.bf16.mxu0 %v1291_v18  ;;  %2026 = vrot.lane.b32.xlu0 %v3215_v47, %s3235_s24 }
 0x304   : > { %v1079_v24 = vadd.f32 %v2779_v23, %v3651_v25  ;;  %v1070_v14 = vpop.f32.mrb[63].mxu0  ;;  %2837 = vmatmul.mubr.bf16.gmra.mrb[72].mxu0 %v1292_v17  ;;  %v1096_v26 = vmax.f32 %v1076_v20, 0.0 }
 0x305   : > { %v1071_v15 = vadd.f32 %v1070_v14, %v3651_v25  ;;  %v1094_v53 = vmax.f32 %v1068_v22, 0.0  ;;  %v3034_v25 = vld [vmem:[%s4238_s1 + $0x260] ss:$8 sps:$4 sm:$0xff]   ;;  %2885 = vmatpush3.bf16.msra.mxu0 %v3044_v38 }
 0x306   : > { %v1097_v39 = vmax.f32 %v1079_v24, 0.0  ;;  %2854 = vmatprep.subr.bf16.mxu1 %v3034_v25  ;;  %2886 = vmatprep.subr.bf16.mxu0 %v3045_v40 }
 0x307   : > { %v1095_v11 = vmax.f32 %v1071_v15, 0.0  ;;  %2855 = vmatpush3.bf16.msra.mxu1 %v3034_v25  ;;  %2024 = vrot.lane.b32.xlu1 %v3216_v48, %s3235_s24 }
 0x308   : > { %v1294_v27 = vpack.c.bf16 %v1097_v39, %v1096_v26  ;;  %2856 = vmatprep.subr.bf16.mxu1 %v3036_v31  ;;  %2030 = vrot.lane.b32.xlu0 %v3217_v49, %s3235_s24 }
 0x309   : > { %v1293_v28 = vpack.c.bf16 %v1095_v11, %v1094_v53  ;;  %2887 = vmatpush3.bf16.msra.mxu0 %v3045_v40 }
 0x30a   : > { %2888 = vmatprep.subr.bf16.mxu0 %v3046_v41 }
 0x30b   : > { %2840 = vmatprep.mubr.bf16.mxu0 %v1293_v28  ;;  %2857 = vmatpush3.bf16.msra.mxu1 %v3036_v31 }
 0x30c   : > { %2841 = vmatmul.mubr.bf16.gmra.mrb[76].mxu0 %v1294_v27  ;;  %2858 = vmatprep.subr.bf16.mxu1 %v3038_v34 }
 0x30d   : > { %2889 = vmatpush3.bf16.msra.mxu0 %v3046_v41  ;;  %2028 = vrot.lane.b32.xlu1 %v3218_v50, %s3235_s24 }
 0x30e   : > { %2890 = vmatprep.subr.bf16.mxu0 %v3047_v4  ;;  %2034 = vrot.lane.b32.xlu0 %v3219_v51, %s3235_s24 }
 0x30f   : > { %2859 = vmatpush3.bf16.msra.mxu1 %v3038_v34 }
 0x311   : > { %2891 = vmatpush3.bf16.msra.mxu0 %v3047_v4  ;;  %2032 = vrot.lane.b32.xlu1 %v3220_v52, %s3235_s24 }
 0x312   : > { %2038 = vrot.lane.b32.xlu0 %v3221_v54, %s3235_s24 }
 0x315   : > { %2036 = vrot.lane.b32.xlu1 %v3222_v55, %s3235_s24 }
 0x319   : > { %2040 = vrot.lane.b32.xlu1 %v3223_v56, %s3235_s24 }
 0x398   : > { %v2798_v60 = vpop.f32.mrb[32].mxu1 }
 0x399   : > { %v1217_v61 = vadd.f32 %v2798_v60, %v3747_v59  ;;  %v1208_v62 = vpop.f32.mrb[33].mxu1 }
 0x39a   : > { %v1209_v5 = vadd.f32 %v1208_v62, %v3747_v59  ;;  %v2799_v6 = vpop.f32.mrb[34].mxu1 }
 0x39b   : > { %3112 = vtanh.f32 %v1217_v61  ;;  %v1220_v1 = vadd.f32 %v2799_v6, %v3747_v59  ;;  %v1211_v8 = vpop.f32.mrb[35].mxu1 }
 0x39c   : > { %3114 = vtanh.f32 %v1209_v5  ;;  %v1212_v9 = vadd.f32 %v1211_v8, %v3747_v59 }
 0x39d   : > { %3116 = vtanh.f32 %v1220_v1 }
 0x39e   : > { %3118 = vtanh.f32 %v1212_v9 }
 0x3a5   : > { %v3113_v10 = vpop.eup %3112 }
 0x3a6   : > { %v3115_v12 = vpop.eup %3114 }
 0x3a7   : > { %v3117_v13 = vpop.eup %3116 }
 0x3a8   : > { %v3119_v7 = vpop.eup %3118  ;;  %v2802_v16 = vpop.f32.mrb[36].mxu1  ;;  %v1461_v17 = vpack.c.bf16 %v3117_v13, %v3113_v10 }
 0x3a9   : > { %v1233_v18 = vadd.f32 %v2802_v16, %v3747_v59  ;;  %v1224_v19 = vpop.f32.mrb[37].mxu1  ;;  %v1460_v20 = vpack.c.bf16 %v3119_v7, %v3115_v12 }
 0x3aa   : > { %v1225_v21 = vadd.f32 %v1224_v19, %v3747_v59  ;;  %v2803_v22 = vpop.f32.mrb[38].mxu1 }
 0x3ab   : > { %3120 = vtanh.f32 %v1233_v18  ;;  %v1236_v23 = vadd.f32 %v2803_v22, %v3747_v59  ;;  %v1227_v24 = vpop.f32.mrb[39].mxu1  ;;  %2860 = vmatprep.mubr.bf16.mxu1 %v1460_v20 }
 0x3ac   : > { %3122 = vtanh.f32 %v1225_v21  ;;  %v1228_v14 = vadd.f32 %v1227_v24, %v3747_v59  ;;  %2861 = vmatmul.mubr.bf16.vlgmr.msra.gmra.mrb[48].mxu1 %v1461_v17 }
 0x3ad   : > { %3124 = vtanh.f32 %v1236_v23 }
 0x3ae   : > { %3126 = vtanh.f32 %v1228_v14 }
 0x3b5   : > { %v3121_v15 = vpop.eup %3120 }
 0x3b6   : > { %v3123_v26 = vpop.eup %3122 }
 0x3b7   : > { %v3125_v39 = vpop.eup %3124 }
 0x3b8   : > { %v3127_v53 = vpop.eup %3126  ;;  %v2806_v11 = vpop.f32.mrb[40].mxu1  ;;  %v1463_v27 = vpack.c.bf16 %v3125_v39, %v3121_v15 }
 0x3b9   : > { %v1249_v28 = vadd.f32 %v2806_v11, %v3747_v59  ;;  %v1240_v29 = vpop.f32.mrb[41].mxu1  ;;  %v1462_v30 = vpack.c.bf16 %v3127_v53, %v3123_v26 }
 0x3ba   : > { %v1241_v25 = vadd.f32 %v1240_v29, %v3747_v59  ;;  %v2807_v31 = vpop.f32.mrb[42].mxu1 }
 0x3bb   : > { %3128 = vtanh.f32 %v1249_v28  ;;  %v1252_v34 = vadd.f32 %v2807_v31, %v3747_v59  ;;  %v1243_v35 = vpop.f32.mrb[43].mxu1  ;;  %2864 = vmatprep.mubr.bf16.mxu1 %v1462_v30 }
 0x3bc   : > { %3130 = vtanh.f32 %v1241_v25  ;;  %v1244_v33 = vadd.f32 %v1243_v35, %v3747_v59  ;;  %2865 = vmatmul.mubr.bf16.gmra.mrb[52].mxu1 %v1463_v27 }
 0x3bd   : > { %3132 = vtanh.f32 %v1252_v34 }
 0x3be   : > { %3134 = vtanh.f32 %v1244_v33 }
 0x3c5   : > { %v3129_v38 = vpop.eup %3128 }
 0x3c6   : > { %v3131_v40 = vpop.eup %3130 }
 0x3c7   : > { %v3133_v41 = vpop.eup %3132  ;;  %v2830_v4 = vpop.f32.mrb[64].mxu0 }
 0x3c8   : > { %v3135_v32 = vpop.eup %3134  ;;  %v1374_v42 = vadd.f32 %v2830_v4, %v3767_v37  ;;  %v2810_v43 = vpop.f32.mrb[44].mxu1  ;;  %v1465_v3 = vpack.c.bf16 %v3133_v41, %v3129_v38 }
 0x3c9   : > { %v1365_v44 = vpop.f32.mrb[65].mxu0  ;;  %v1265_v45 = vadd.f32 %v2810_v43, %v3747_v59  ;;  %v1256_v47 = vpop.f32.mrb[45].mxu1  ;;  %v1464_v49 = vpack.c.bf16 %v3135_v32, %v3131_v40 }
 0x3ca   : > { %v1366_v46 = vadd.f32 %v1365_v44, %v3767_v37  ;;  %v2831_v48 = vpop.f32.mrb[66].mxu0  ;;  %v1257_v50 = vadd.f32 %v1256_v47, %v3747_v59  ;;  %v2811_v52 = vpop.f32.mrb[46].mxu1  ;;  %v1430_v60 = vmax.f32 %v1374_v42, 0.0 }
 0x3cb   : > { %v1377_v51 = vadd.f32 %v2831_v48, %v3767_v37  ;;  %v1368_v54 = vpop.f32.mrb[67].mxu0  ;;  %3136 = vtanh.f32 %v1265_v45  ;;  %v1268_v55 = vadd.f32 %v2811_v52, %v3747_v59  ;;  %v1259_v57 = vpop.f32.mrb[47].mxu1  ;;  %2868 = vmatprep.mubr.bf16.mxu1 %v1464_v49 }
 0x3cc   : > { %v1369_v56 = vadd.f32 %v1368_v54, %v3767_v37  ;;  %3138 = vtanh.f32 %v1257_v50  ;;  %v1260_v62 = vadd.f32 %v1259_v57, %v3747_v59  ;;  %2869 = vmatmul.mubr.bf16.gmra.mrb[56].mxu1 %v1465_v3  ;;  %v1428_v5 = vmax.f32 %v1366_v46, 0.0 }
 0x3cd   : > { %v1431_v61 = vmax.f32 %v1377_v51, 0.0  ;;  %3140 = vtanh.f32 %v1268_v55  ;;  %v1470_v55 = vsub.s32 4, %v3424_v0 }
 0x3ce   : > { %v1429_v6 = vmax.f32 %v1369_v56, 0.0  ;;  %3142 = vtanh.f32 %v1260_v62 }
 0x3cf   : > { %v1634_v1 = vpack.c.bf16 %v1431_v61, %v1430_v60  ;;  %v2834_v9 = vpop.f32.mrb[68].mxu0  ;;  %v3791_v56 = vrot.slane %v3744_v58, %v1470_v55 }
 0x3d0   : > { %v1633_v8 = vpack.c.bf16 %v1429_v6, %v1428_v5  ;;  %v1390_v10 = vadd.f32 %v2834_v9, %v3767_v37  ;;  %v1381_v12 = vpop.f32.mrb[69].mxu0 }
 0x3d1   : > { %v1382_v13 = vadd.f32 %v1381_v12, %v3767_v37  ;;  %v2835_v7 = vpop.f32.mrb[70].mxu0 }
 0x3d2   : > { %2892 = vmatprep.mubr.bf16.mxu0 %v1633_v8  ;;  %v1393_v16 = vadd.f32 %v2835_v7, %v3767_v37  ;;  %v1384_v17 = vpop.f32.mrb[71].mxu0  ;;  %v1434_v18 = vmax.f32 %v1390_v10, 0.0  ;;  %v1792_v8 = vsub.s32 6, %v3424_v0 }
 0x3d3   : > { %2893 = vmatmul.mubr.bf16.vlgmr.msra.gmra.mrb[80].mxu0 %v1634_v1  ;;  %v1385_v59 = vadd.f32 %v1384_v17, %v3767_v37  ;;  %v1432_v21 = vmax.f32 %v1382_v13, 0.0 }
 0x3d4   : > { %v1435_v19 = vmax.f32 %v1393_v16, 0.0  ;;  %v3799_v9 = vrot.slane %v3744_v58, %v1792_v8 }
 0x3d5   : > { %v3137_v20 = vpop.eup %3136  ;;  %v1433_v22 = vmax.f32 %v1385_v59, 0.0 }
 0x3d6   : > { %v3139_v23 = vpop.eup %3138  ;;  %v1636_v24 = vpack.c.bf16 %v1435_v19, %v1434_v18 }
 0x3d7   : > { %v3141_v14 = vpop.eup %3140  ;;  %v1635_v15 = vpack.c.bf16 %v1433_v22, %v1432_v21  ;;  %v2838_v26 = vpop.f32.mrb[72].mxu0 }
 0x3d8   : > { %v3143_v39 = vpop.eup %3142  ;;  %v1406_v53 = vadd.f32 %v2838_v26, %v3767_v37  ;;  %v1397_v11 = vpop.f32.mrb[73].mxu0  ;;  %v1467_v27 = vpack.c.bf16 %v3141_v14, %v3137_v20 }
 0x3d9   : > { %v1398_v28 = vadd.f32 %v1397_v11, %v3767_v37  ;;  %v2839_v29 = vpop.f32.mrb[74].mxu0  ;;  %2896 = vmatprep.mubr.bf16.mxu0 %v1635_v15  ;;  %v1466_v30 = vpack.c.bf16 %v3143_v39, %v3139_v23 }
 0x3da   : > { %v1409_v25 = vadd.f32 %v2839_v29, %v3767_v37  ;;  %v1400_v31 = vpop.f32.mrb[75].mxu0  ;;  %v1438_v35 = vmax.f32 %v1406_v53, 0.0 }
 0x3db   : > { %2897 = vmatmul.mubr.bf16.gmra.mrb[84].mxu0 %v1636_v24  ;;  %v1401_v34 = vadd.f32 %v1400_v31, %v3767_v37  ;;  %2872 = vmatprep.mubr.bf16.mxu1 %v1466_v30  ;;  %v1436_v38 = vmax.f32 %v1398_v28, 0.0 }
 0x3dc   : > { %v1439_v33 = vmax.f32 %v1409_v25, 0.0  ;;  %2873 = vmatmul.mubr.bf16.gmra.mrb[60].mxu1 %v1467_v27 }
 0x3dd   : > { %v1437_v40 = vmax.f32 %v1401_v34, 0.0 }
 0x3de   : > { %v1638_v41 = vpack.c.bf16 %v1439_v33, %v1438_v35  ;;  %v3814_v33 = vrot.slane %v3764_v36, %v1470_v55 }
 0x3df   : > { %v1637_v4 = vpack.c.bf16 %v1437_v40, %v1436_v38  ;;  %v2842_v32 = vpop.f32.mrb[76].mxu0 }
 0x3e0   : > { %v1422_v42 = vadd.f32 %v2842_v32, %v3767_v37  ;;  %v1413_v43 = vpop.f32.mrb[77].mxu0 }
 0x3e1   : > { %v1414_v44 = vadd.f32 %v1413_v43, %v3767_v37  ;;  %v2843_v3 = vpop.f32.mrb[78].mxu0  ;;  %2900 = vmatprep.mubr.bf16.mxu0 %v1637_v4  ;;  %v3821_v43 = vrot.slane %v3764_v36, %v1792_v8 }
 0x3e2   : > { %v1425_v45 = vadd.f32 %v2843_v3, %v3767_v37  ;;  %v1416_v46 = vpop.f32.mrb[79].mxu0  ;;  %v1442_v48 = vmax.f32 %v1422_v42, 0.0 }
 0x3e3   : > { %2901 = vmatmul.mubr.bf16.gmra.mrb[88].mxu0 %v1638_v41  ;;  %v1417_v47 = vadd.f32 %v1416_v46, %v3767_v37  ;;  %v1440_v50 = vmax.f32 %v1414_v44, 0.0 }
 0x3e4   : > { %v1443_v49 = vmax.f32 %v1425_v45, 0.0 }
 0x3e5   : > { %v1441_v51 = vmax.f32 %v1417_v47, 0.0 }
 0x3e6   : > { %v1640_v52 = vpack.c.bf16 %v1443_v49, %v1442_v48 }
 0x3e7   : > { %v1639_v54 = vpack.c.bf16 %v1441_v51, %v1440_v50 }
 0x3e9   : > { %2904 = vmatprep.mubr.bf16.mxu0 %v1639_v54 }
 0x3eb   : > { %2905 = vmatmul.mubr.bf16.gmra.mrb[92].mxu0 %v1640_v52 }
 0x47f   : > { %v2862_v57 = vpop.f32.mrb[48].mxu1 }
 0x480   : > { %v1563_v60 = vadd.f32 %v2862_v57, %v3791_v56  ;;  %v1554_v61 = vpop.f32.mrb[49].mxu1 }
 0x481   : > { %v1555_v62 = vadd.f32 %v1554_v61, %v3791_v56  ;;  %v2863_v37 = vpop.f32.mrb[50].mxu1 }
 0x482   : > { %3144 = vtanh.f32 %v1563_v60  ;;  %v1566_v5 = vadd.f32 %v2863_v37, %v3791_v56  ;;  %v1557_v6 = vpop.f32.mrb[51].mxu1 }
 0x483   : > { %3146 = vtanh.f32 %v1555_v62  ;;  %v1558_v1 = vadd.f32 %v1557_v6, %v3791_v56 }
 0x484   : > { %3148 = vtanh.f32 %v1566_v5 }
 0x485   : > { %3150 = vtanh.f32 %v1558_v1 }
 0x48c   : > { %v3145_v10 = vpop.eup %3144 }
 0x48d   : > { %v3147_v12 = vpop.eup %3146  ;;  %v1796_v13 = vmul.f32 %v3145_v10, %v3799_v9 }
 0x48e   : > { %v3149_v7 = vpop.eup %3148  ;;  %v1794_v16 = vmul.f32 %v3147_v12, %v3799_v9 }
 0x48f   : > { %v3151_v17 = vpop.eup %3150  ;;  %1814 = vadd.xlane.f32.xlu1 %v1796_v13  ;;  %v2866_v59 = vpop.f32.mrb[52].mxu1  ;;  %v1797_v22 = vmul.f32 %v3149_v7, %v3799_v9 }
 0x490   : > { %v1579_v18 = vadd.f32 %v2866_v59, %v3791_v56  ;;  %v1570_v19 = vpop.f32.mrb[53].mxu1  ;;  %1810 = vadd.xlane.f32.xlu0 %v1794_v16  ;;  %v1795_v14 = vmul.f32 %v3151_v17, %v3799_v9 }
 0x491   : > { %v1571_v20 = vadd.f32 %v1570_v19, %v3791_v56  ;;  %v2867_v21 = vpop.f32.mrb[54].mxu1 }
 0x492   : > { %3152 = vtanh.f32 %v1579_v18  ;;  %v1582_v23 = vadd.f32 %v2867_v21, %v3791_v56  ;;  %v1573_v24 = vpop.f32.mrb[55].mxu1 }
 0x493   : > { %3154 = vtanh.f32 %v1571_v20  ;;  %v1574_v15 = vadd.f32 %v1573_v24, %v3791_v56  ;;  %1816 = vadd.xlane.f32.xlu1 %v1797_v22 }
 0x494   : > { %3156 = vtanh.f32 %v1582_v23  ;;  %1812 = vadd.xlane.f32.xlu0 %v1795_v14 }
 0x495   : > { %3158 = vtanh.f32 %v1574_v15 }
 0x49c   : > { %v3153_v26 = vpop.eup %3152 }
 0x49d   : > { %v3155_v39 = vpop.eup %3154  ;;  %v1800_v53 = vmul.f32 %v3153_v26, %v3799_v9 }
 0x49e   : > { %v3157_v11 = vpop.eup %3156  ;;  %v1798_v34 = vmul.f32 %v3155_v39, %v3799_v9 }
 0x49f   : > { %v2870_v27 = vpop.f32.mrb[56].mxu1  ;;  %1822 = vadd.xlane.f32.xlu0 %v1800_v53  ;;  %v1801_v28 = vmul.f32 %v3157_v11, %v3799_v9  ;;  %v3159_v29 = vpop.eup %3158 }
 0x4a0   : > { %v1586_v30 = vpop.f32.mrb[57].mxu1  ;;  %v1595_v25 = vadd.f32 %v2870_v27, %v3791_v56  ;;  %v1799_v40 = vmul.f32 %v3159_v29, %v3799_v9 }
 0x4a1   : > { %1824 = vadd.xlane.f32.xlu1 %v1801_v28  ;;  %v2871_v31 = vpop.f32.mrb[58].mxu1  ;;  %v1587_v41 = vadd.f32 %v1586_v30, %v3791_v56 }
 0x4a2   : > { %v1589_v35 = vpop.f32.mrb[59].mxu1  ;;  %v1598_v38 = vadd.f32 %v2871_v31, %v3791_v56  ;;  %3160 = vtanh.f32 %v1595_v25  ;;  %v3236_v31 = vmov 1  }
 0x4a3   : > { %1818 = vadd.xlane.f32.xlu0 %v1798_v34  ;;  %v1590_v44 = vadd.f32 %v1589_v35, %v3791_v56 }
 0x4a4   : > { %3162 = vtanh.f32 %v1598_v38  ;;  %2922 = vset.pattern.permute.xlu0 %v3236_v31 }
 0x4a5   : > { %1820 = vadd.xlane.f32.xlu1 %v1799_v40  ;;  %3164 = vtanh.f32 %v1587_v41 }
 0x4a6   : > { %v2894_v4 = vpop.f32.mrb[80].mxu0  ;;  %3166 = vtanh.f32 %v1590_v44 }
 0x4a7   : > { %v1720_v32 = vadd.f32 %v2894_v4, %v3814_v33  ;;  %v1711_v42 = vpop.f32.mrb[81].mxu0 }
 0x4a8   : > { %v1712_v3 = vadd.f32 %v1711_v42, %v3814_v33  ;;  %v2895_v45 = vpop.f32.mrb[82].mxu0 }
 0x4a9   : > { %v1776_v46 = vmax.f32 %v1720_v32, 0.0  ;;  %v1723_v47 = vadd.f32 %v2895_v45, %v3814_v33  ;;  %v1714_v48 = vpop.f32.mrb[83].mxu0 }
 0x4aa   : > { %v1715_v49 = vadd.f32 %v1714_v48, %v3814_v33  ;;  %v1774_v50 = vmax.f32 %v1712_v3, 0.0 }
 0x4ab   : > { %v1777_v51 = vmax.f32 %v1723_v47, 0.0  ;;  %v1868_v52 = vmul.f32 %v3821_v43, %v1776_v46 }
 0x4ac   : > { %v1775_v36 = vmax.f32 %v1715_v49, 0.0  ;;  %v1866_v60 = vmul.f32 %v3821_v43, %v1774_v50  ;;  %v3161_v61 = vpop.eup %3160 }
 0x4ad   : > { %1886 = vadd.xlane.f32.xlu0 %v1868_v52  ;;  %v1869_v54 = vmul.f32 %v3821_v43, %v1777_v51  ;;  %v1804_v17 = vmul.f32 %v3161_v61, %v3799_v9 }
 0x4ae   : > { %v2898_v55 = vpop.f32.mrb[84].mxu0  ;;  %v1867_v1 = vmul.f32 %v3821_v43, %v1775_v36  ;;  %v3163_v8 = vpop.eup %3162 }
 0x4af   : > { %v1727_v57 = vpop.f32.mrb[85].mxu0  ;;  %1888 = vadd.xlane.f32.xlu1 %v1869_v54  ;;  %v2874_v62 = vpop.f32.mrb[60].mxu1  ;;  %v1736_v13 = vadd.f32 %v2898_v55, %v3814_v33  ;;  %v1805_v20 = vmul.f32 %v3163_v8, %v3799_v9 }
 0x4b0   : > { %v2899_v37 = vpop.f32.mrb[86].mxu0  ;;  %v1602_v5 = vpop.f32.mrb[61].mxu1  ;;  %v1728_v24 = vadd.f32 %v1727_v57, %v3814_v33  ;;  %v1611_v28 = vadd.f32 %v2874_v62, %v3791_v56 }
 0x4b1   : > { %v1730_v6 = vpop.f32.mrb[87].mxu0  ;;  %1882 = vadd.xlane.f32.xlu0 %v1866_v60  ;;  %v1603_v10 = vadd.f32 %v1602_v5, %v3791_v56  ;;  %v2875_v12 = vpop.f32.mrb[62].mxu1  ;;  %v1739_v19 = vadd.f32 %v2899_v37, %v3814_v33  ;;  %v1780_v23 = vmax.f32 %v1736_v13, 0.0 }
 0x4b2   : > { %v1614_v7 = vadd.f32 %v2875_v12, %v3791_v56  ;;  %v1605_v16 = vpop.f32.mrb[63].mxu1  ;;  %v3165_v59 = vpop.eup %3164  ;;  %v1731_v53 = vadd.f32 %v1730_v6, %v3814_v33  ;;  %v1778_v29 = vmax.f32 %v1728_v24, 0.0 }
 0x4b3   : > { %1884 = vadd.xlane.f32.xlu1 %v1867_v1  ;;  %3168 = vtanh.f32 %v1603_v10  ;;  %v1606_v18 = vadd.f32 %v1605_v16, %v3791_v56  ;;  %v3167_v21 = vpop.eup %3166  ;;  %v1802_v15 = vmul.f32 %v3165_v59, %v3799_v9  ;;  %v1781_v39 = vmax.f32 %v1739_v19, 0.0  ;;  %v3870_v19 = vpop.permute.xlu0 %2010 }
 0x4b4   : > { %3170 = vtanh.f32 %v1614_v7  ;;  %v1803_v27 = vmul.f32 %v3167_v21, %v3799_v9  ;;  %v1872_v25 = vmul.f32 %v3821_v43, %v1780_v23  ;;  %v1779_v34 = vmax.f32 %v1731_v53, 0.0 }
 0x4b5   : > { %1830 = vadd.xlane.f32.xlu0 %v1804_v17  ;;  %3172 = vtanh.f32 %v1606_v18  ;;  %v1873_v38 = vmul.f32 %v3821_v43, %v1781_v39  ;;  %v1870_v44 = vmul.f32 %v3821_v43, %v1778_v29  ;;  %v3868_v18 = vpop.permute.xlu1 %2012  ;;  %v1844_v39 = vsub.s32 5, %v3424_v0 }
 0x4b6   : > { %v2902_v22 = vpop.f32.mrb[88].mxu0  ;;  %3174 = vtanh.f32 %v1611_v28  ;;  %v1871_v51 = vmul.f32 %v3821_v43, %v1779_v34 }
 0x4b7   : > { %v1743_v14 = vpop.f32.mrb[89].mxu0  ;;  %1832 = vadd.xlane.f32.xlu1 %v1805_v20  ;;  %v1752_v30 = vadd.f32 %v2902_v22, %v3814_v33  ;;  %v3874_v20 = vpop.permute.xlu0 %2018 }
 0x4b8   : > { %v2903_v26 = vpop.f32.mrb[90].mxu0  ;;  %v1744_v32 = vadd.f32 %v1743_v14, %v3814_v33 }
 0x4b9   : > { %v1746_v11 = vpop.f32.mrb[91].mxu0  ;;  %1826 = vadd.xlane.f32.xlu0 %v1802_v15  ;;  %v1755_v35 = vadd.f32 %v2903_v26, %v3814_v33  ;;  %v1784_v56 = vmax.f32 %v1752_v30, 0.0 }
 0x4ba   : > { %v1747_v49 = vadd.f32 %v1746_v11, %v3814_v33  ;;  %v1782_v36 = vmax.f32 %v1744_v32, 0.0 }
 0x4bb   : > { %1828 = vadd.xlane.f32.xlu1 %v1803_v27  ;;  %v1785_v48 = vmax.f32 %v1755_v35, 0.0  ;;  %v1876_v54 = vmul.f32 %v3821_v43, %v1784_v56  ;;  %v3878_v22 = vpop.permute.xlu0 %2022  ;;  %v3898_v27 = vrot.slane %v3744_v58, %v1844_v39 }
 0x4bc   : > { %v1783_v55 = vmax.f32 %v1747_v49, 0.0  ;;  %v1874_v60 = vmul.f32 %v3821_v43, %v1782_v36 }
 0x4bd   : > { %1894 = vadd.xlane.f32.xlu0 %v1872_v25  ;;  %v3169_v40 = vpop.eup %3168  ;;  %v1877_v57 = vmul.f32 %v3821_v43, %v1785_v48 }
 0x4be   : > { %v2906_v41 = vpop.f32.mrb[92].mxu0  ;;  %v3171_v4 = vpop.eup %3170  ;;  %v1806_v3 = vmul.f32 %v3169_v40, %v3799_v9  ;;  %v1875_v62 = vmul.f32 %v3821_v43, %v1783_v55 }
 0x4bf   : > { %v1759_v42 = vpop.f32.mrb[93].mxu0  ;;  %1896 = vadd.xlane.f32.xlu1 %v1873_v38  ;;  %v3173_v45 = vpop.eup %3172  ;;  %v1809_v47 = vmul.f32 %v3171_v4, %v3799_v9  ;;  %v1768_v37 = vadd.f32 %v2906_v41, %v3814_v33 }
 0x4c0   : > { %v2907_v46 = vpop.f32.mrb[94].mxu0  ;;  %v1807_v52 = vmul.f32 %v3173_v45, %v3799_v9  ;;  %v3175_v61 = vpop.eup %3174  ;;  %v1760_v8 = vadd.f32 %v1759_v42, %v3814_v33 }
 0x4c1   : > { %v1762_v50 = vpop.f32.mrb[95].mxu0  ;;  %1890 = vadd.xlane.f32.xlu0 %v1870_v44  ;;  %v1808_v5 = vmul.f32 %v3175_v61, %v3799_v9  ;;  %v1771_v6 = vadd.f32 %v2907_v46, %v3814_v33  ;;  %v1788_v1 = vmax.f32 %v1768_v37, 0.0  ;;  %v3882_v24 = vpop.permute.xlu0 %2026 }
 0x4c2   : > { %v1763_v12 = vadd.f32 %v1762_v50, %v3814_v33  ;;  %v1786_v13 = vmax.f32 %v1760_v8, 0.0  ;;  %v3872_v33 = vpop.permute.xlu1 %2014 }
 0x4c3   : > { %1892 = vadd.xlane.f32.xlu1 %v1871_v51  ;;  %v1789_v10 = vmax.f32 %v1771_v6, 0.0  ;;  %v1880_v7 = vmul.f32 %v3821_v43, %v1788_v1 }
 0x4c4   : > { %v1787_v16 = vmax.f32 %v1763_v12, 0.0  ;;  %v1878_v9 = vmul.f32 %v3821_v43, %v1786_v13 }
 0x4c5   : > { %1902 = vadd.xlane.f32.xlu0 %v1876_v54  ;;  %v1881_v17 = vmul.f32 %v3821_v43, %v1789_v10 }
 0x4c6   : > { %v1879_v59 = vmul.f32 %v3821_v43, %v1787_v16  ;;  %v3876_v21 = vpop.permute.xlu1 %2016  ;;  %v3886_v43 = vpop.permute.xlu0 %2030 }
 0x4c7   : > { %1904 = vadd.xlane.f32.xlu1 %v1877_v57 }
 0x4c9   : > { %1898 = vadd.xlane.f32.xlu0 %v1874_v60 }
 0x4ca   : > { %v3880_v23 = vpop.permute.xlu1 %2020  ;;  %v3890_v26 = vpop.permute.xlu0 %2034 }
 0x4cb   : > { %1900 = vadd.xlane.f32.xlu1 %v1875_v62 }
 0x4cd   : > { %1838 = vadd.xlane.f32.xlu0 %v1808_v5 }
 0x4ce   : > { %v3884_v14 = vpop.permute.xlu1 %2024  ;;  %v3895_v11 = vpop.permute.xlu0 %2038 }
 0x4cf   : > { %1840 = vadd.xlane.f32.xlu1 %v1809_v47 }
 0x4d1   : > { %1834 = vadd.xlane.f32.xlu0 %v1806_v3 }
 0x4d2   : > { %v3888_v15 = vpop.permute.xlu1 %2028 }
 0x4d3   : > { %1836 = vadd.xlane.f32.xlu1 %v1807_v52 }
 0x4d5   : > { %1910 = vadd.xlane.f32.xlu0 %v1880_v7 }
 0x4d6   : > { %v3893_v53 = vpop.permute.xlu1 %2032 }
 0x4d7   : > { %1912 = vadd.xlane.f32.xlu1 %v1881_v17 }
 0x4d9   : > { %1906 = vadd.xlane.f32.xlu0 %v1878_v9 }
 0x4da   : > { %v3900_v28 = vpop.permute.xlu1 %2036 }
 0x4db   : > { %1908 = vadd.xlane.f32.xlu1 %v1879_v59 }
 0x4de   : > { %v3906_v25 = vpop.permute.xlu1 %2040 }
 0x51c   : > { %v3909_v0 = vpop.xlane.xlu1 %1814 }
 0x51d   : > { %v1811_v29 = vpop.xlane.xlu0 %1810 }
 0x51e   : > { %v3903_v30 = vadd.f32 %v3898_v27, %v1811_v29 }
 0x520   : > { %2257 = vperm.xlu1 %2920, %v3903_v30   ;;  %v3913_v35 = vpop.xlane.xlu1 %1816 }
 0x521   : > { %v3911_v34 = vpop.xlane.xlu0 %1812 }
 0x524   : > { %2921 = vset.pattern.permute.xlu1 %v3236_v31 }
 0x52c   : > { %v3915_v58 = vpop.xlane.xlu0 %1822 }
 0x52e   : > { %v3917_v38 = vpop.xlane.xlu1 %1824 }
 0x530   : > { %v3919_v40 = vpop.xlane.xlu0 %1818 }
 0x532   : > { %v3921_v41 = vpop.xlane.xlu1 %1820 }
 0x53a   : > { %v1887_v4 = vpop.xlane.xlu0 %1886 }
 0x53b   : > { %v1916_v56 = vadd.f32 %v1887_v4, %v3898_v27 }
 0x53c   : > { %v1889_v32 = vpop.xlane.xlu1 %1888 }
 0x53d   : > { %2171 = vperm.xlu1 %2921, %v1916_v56   ;;  %v1917_v31 = vadd.f32 %v1889_v32, %v3898_v27  ;;  %v1932_v3 = vmul.f32 0.5, %v1916_v56 }
 0x53e   : > { %v1883_v42 = vpop.xlane.xlu0 %1882 }
 0x53f   : > { %v1914_v44 = vadd.f32 %v1883_v42, %v3898_v27  ;;  %v1933_v47 = vmul.f32 0.5, %v1917_v31  ;;  %v1950_v49 = vmul.f32 1.442695, %v1932_v3 }
 0x540   : > { %v1885_v45 = vpop.xlane.xlu1 %1884 }
 0x541   : > { %v1915_v46 = vadd.f32 %v1885_v45, %v3898_v27  ;;  %2161 = vperm.xlu0 %2922, %v1914_v44   ;;  %v1952_v51 = vmul.f32 1.442695, %v1933_v47  ;;  %3176 = vpow2.f32 %v1950_v49  ;;  %v1930_v54 = vmul.f32 0.5, %v1914_v44 }
 0x542   : > { %v3927_v48 = vpop.xlane.xlu0 %1830 }
 0x543   : > { %2166 = vperm.xlu1 %2921, %v1915_v46   ;;  %v1931_v52 = vmul.f32 0.5, %v1915_v46  ;;  %3178 = vpow2.f32 %v1952_v51  ;;  %v1946_v62 = vmul.f32 1.442695, %v1930_v54 }
 0x544   : > { %v3929_v50 = vpop.xlane.xlu1 %1832 }
 0x545   : > { %2176 = vperm.xlu0 %2922, %v1917_v31   ;;  %v1948_v57 = vmul.f32 1.442695, %v1931_v52 }
 0x546   : > { %v3931_v36 = vpop.xlane.xlu0 %1826 }
 0x547   : > { %3180 = vpow2.f32 %v1948_v57 }
 0x548   : > { %v3933_v55 = vpop.xlane.xlu1 %1828  ;;  %3182 = vpow2.f32 %v1946_v62 }
 0x54a   : > { %v1895_v60 = vpop.xlane.xlu0 %1894 }
 0x54b   : > { %v1920_v61 = vadd.f32 %v1895_v60, %v3898_v27  ;;  %v3177_v13 = vpop.eup %3176 }
 0x54c   : > { %v1897_v37 = vpop.xlane.xlu1 %1896  ;;  %v1980_v4 = vadd.f32 1e-05, %v3177_v13 }
 0x54d   : > { %v1921_v5 = vadd.f32 %v1897_v37, %v3898_v27  ;;  %2191 = vperm.xlu1 %2921, %v1920_v61   ;;  %v1936_v8 = vmul.f32 0.5, %v1920_v61  ;;  %v3179_v9 = vpop.eup %3178 }
 0x54e   : > { %v1891_v6 = vpop.xlane.xlu0 %1890  ;;  %v1981_v44 = vadd.f32 1e-05, %v3179_v9  ;;  %v2060_v47 = vmul.f32 %v3872_v33, %v1980_v4 }
 0x54f   : > { %v1918_v1 = vadd.f32 %v1891_v6, %v3898_v27  ;;  %2196 = vperm.xlu0 %2922, %v1921_v5   ;;  %v1937_v7 = vmul.f32 0.5, %v1921_v5  ;;  %v1958_v59 = vmul.f32 1.442695, %v1936_v8 }
 0x550   : > { %v1893_v10 = vpop.xlane.xlu1 %1892  ;;  %v2061_v60 = vmul.f32 %v3876_v21, %v1981_v44 }
 0x551   : > { %v1919_v12 = vadd.f32 %v1893_v10, %v3898_v27  ;;  %2181 = vperm.xlu1 %2921, %v1918_v1   ;;  %v1960_v56 = vmul.f32 1.442695, %v1937_v7  ;;  %v3181_v3 = vpop.eup %3180  ;;  %3184 = vpow2.f32 %v1958_v59  ;;  %v1934_v45 = vmul.f32 0.5, %v1918_v1 }
 0x552   : > { %v1903_v16 = vpop.xlane.xlu0 %1902  ;;  %v3183_v49 = vpop.eup %3182  ;;  %v1979_v61 = vadd.f32 1e-05, %v3181_v3 }
 0x553   : > { %v1924_v17 = vadd.f32 %v1903_v16, %v3898_v27  ;;  %2186 = vperm.xlu0 %2922, %v1919_v12   ;;  %v1935_v32 = vmul.f32 0.5, %v1919_v12  ;;  %3186 = vpow2.f32 %v1960_v56  ;;  %v1954_v62 = vmul.f32 1.442695, %v1934_v45 }
 0x554   : > { %v1905_v39 = vpop.xlane.xlu1 %1904  ;;  %v1978_v33 = vadd.f32 1e-05, %v3183_v49  ;;  %v2059_v10 = vmul.f32 %v3868_v18, %v1979_v61 }
 0x555   : > { %v1925_v29 = vadd.f32 %v1905_v39, %v3898_v27  ;;  %2211 = vperm.xlu1 %2921, %v1924_v17   ;;  %v1956_v51 = vmul.f32 1.442695, %v1935_v32  ;;  %v1940_v37 = vmul.f32 0.5, %v1924_v17 }
 0x556   : > { %v1899_v31 = vpop.xlane.xlu0 %1898  ;;  %v2058_v7 = vmul.f32 %v3870_v19, %v1978_v33 }
 0x557   : > { %v1922_v42 = vadd.f32 %v1899_v31, %v3898_v27  ;;  %2216 = vperm.xlu0 %2922, %v1925_v29   ;;  %v1941_v52 = vmul.f32 0.5, %v1925_v29  ;;  %3188 = vpow2.f32 %v1956_v51  ;;  %v1966_v12 = vmul.f32 1.442695, %v1940_v37 }
 0x558   : > { %v1901_v46 = vpop.xlane.xlu1 %1900  ;;  %3190 = vpow2.f32 %v1954_v62 }
 0x559   : > { %2201 = vperm.xlu1 %2921, %v1922_v42   ;;  %v1923_v54 = vadd.f32 %v1901_v46, %v3898_v27  ;;  %v1968_v6 = vmul.f32 1.442695, %v1941_v52  ;;  %v1938_v13 = vmul.f32 0.5, %v1922_v42 }
 0x55a   : > { %v3944_v57 = vpop.xlane.xlu0 %1838 }
 0x55b   : > { %2094 = vrot.lane.b32.xlu0 %v2060_v47, %s3237_s29  ;;  %v1939_v1 = vmul.f32 0.5, %v1923_v54  ;;  %v3185_v16 = vpop.eup %3184  ;;  %3192 = vpow2.f32 %v1968_v6  ;;  %v1962_v18 = vmul.f32 1.442695, %v1938_v13 }
 0x55c   : > { %v3948_v5 = vpop.xlane.xlu1 %1840  ;;  %3194 = vpow2.f32 %v1966_v12  ;;  %v1984_v32 = vadd.f32 1e-05, %v3185_v16 }
 0x55d   : > { %2096 = vrot.lane.b32.xlu1 %v2061_v60, %s3237_s29  ;;  %v1964_v17 = vmul.f32 1.442695, %v1939_v1  ;;  %v3187_v39 = vpop.eup %3186 }
 0x55e   : > { %v3951_v8 = vpop.xlane.xlu0 %1834  ;;  %v1985_v44 = vadd.f32 1e-05, %v3187_v39  ;;  %v2064_v51 = vmul.f32 %v3878_v22, %v1984_v32 }
 0x55f   : > { %2206 = vperm.xlu0 %2922, %v1923_v54   ;;  %3196 = vpow2.f32 %v1964_v17 }
 0x560   : > { %v3954_v21 = vpop.xlane.xlu1 %1836  ;;  %3198 = vpow2.f32 %v1962_v18  ;;  %v2065_v61 = vmul.f32 %v3884_v14, %v1985_v44 }
 0x561   : > { %2092 = vrot.lane.b32.xlu1 %v2059_v10, %s3237_s29  ;;  %v3189_v3 = vpop.eup %3188 }
 0x562   : > { %v1911_v9 = vpop.xlane.xlu0 %1910  ;;  %v3191_v52 = vpop.eup %3190  ;;  %v1983_v62 = vadd.f32 1e-05, %v3189_v3 }
 0x563   : > { %v1928_v59 = vadd.f32 %v1911_v9, %v3898_v27  ;;  %2090 = vrot.lane.b32.xlu0 %v2058_v7, %s3237_s29  ;;  %v1982_v6 = vadd.f32 1e-05, %v3191_v52 }
 0x564   : > { %v1913_v29 = vpop.xlane.xlu1 %1912  ;;  %v2063_v22 = vmul.f32 %v3880_v23, %v1983_v62 }
 0x565   : > { %v1944_v4 = vmul.f32 0.5, %v1928_v59  ;;  %v1929_v56 = vadd.f32 %v1913_v29, %v3898_v27  ;;  %2231 = vperm.xlu1 %2921, %v1928_v59   ;;  %v3193_v37 = vpop.eup %3192  ;;  %v2062_v14 = vmul.f32 %v3874_v20, %v1982_v6 }
 0x566   : > { %v1907_v31 = vpop.xlane.xlu0 %1906  ;;  %v3195_v1 = vpop.eup %3194  ;;  %v1989_v12 = vadd.f32 1e-05, %v3193_v37 }
 0x567   : > { %v1945_v19 = vmul.f32 0.5, %v1929_v56  ;;  %v1926_v42 = vadd.f32 %v1907_v31, %v3898_v27  ;;  %2236 = vperm.xlu0 %2922, %v1929_v56   ;;  %v1974_v45 = vmul.f32 1.442695, %v1944_v4  ;;  %v1988_v7 = vadd.f32 1e-05, %v3195_v1 }
 0x568   : > { %v1909_v46 = vpop.xlane.xlu1 %1908  ;;  %v2069_v17 = vmul.f32 %v3893_v53, %v1989_v12 }
 0x569   : > { %v1942_v47 = vmul.f32 0.5, %v1926_v42  ;;  %v1927_v49 = vadd.f32 %v1909_v46, %v3898_v27  ;;  %2221 = vperm.xlu1 %2921, %v1926_v42   ;;  %v1976_v54 = vmul.f32 1.442695, %v1945_v19  ;;  %3200 = vpow2.f32 %v1974_v45  ;;  %v3197_v13 = vpop.eup %3196 }
 0x56a   : > { %v3199_v16 = vpop.eup %3198  ;;  %v1987_v9 = vadd.f32 1e-05, %v3197_v13  ;;  %v2068_v23 = vmul.f32 %v3886_v43, %v1988_v7  ;;  %v1847_v42 = vadd.f32 %v3898_v27, %v3911_v34  ;;  %v1853_v34 = vadd.f32 %v3898_v27, %v3917_v38 }
 0x56b   : > { %v1943_v60 = vmul.f32 0.5, %v1927_v49  ;;  %2102 = vrot.lane.b32.xlu0 %v2064_v51, %s3237_s29  ;;  %v1970_v33 = vmul.f32 1.442695, %v1942_v47  ;;  %3202 = vpow2.f32 %v1976_v54  ;;  %v1986_v59 = vadd.f32 1e-05, %v3199_v16 }
 0x56c   : > { %v2067_v20 = vmul.f32 %v3888_v15, %v1987_v9  ;;  %v1857_v38 = vadd.f32 %v3898_v27, %v3929_v50  ;;  %v4039_v50 = vadd.f32 %v3898_v27, %v3948_v5 }
 0x56d   : > { %2104 = vrot.lane.b32.xlu1 %v2065_v61, %s3237_s29  ;;  %v1972_v10 = vmul.f32 1.442695, %v1943_v60  ;;  %3204 = vpow2.f32 %v1970_v33  ;;  %v2066_v29 = vmul.f32 %v3882_v24, %v1986_v59 }
 0x56e   : > { %2924 = vset.pattern.permute.xlu1 %v3234_v2 }
 0x56f   : > { %2226 = vperm.xlu0 %2922, %v1927_v49   ;;  %3206 = vpow2.f32 %v1972_v10 }
 0x571   : > { %2100 = vrot.lane.b32.xlu1 %v2063_v22, %s3237_s29 }
 0x573   : > { %2098 = vrot.lane.b32.xlu0 %v2062_v14, %s3237_s29  ;;  %v3201_v39 = vpop.eup %3200 }
 0x574   : > { %2923 = vset.pattern.permute.xlu0 %v3234_v2  ;;  %v1992_v4 = vadd.f32 1e-05, %v3201_v39  ;;  %v1848_v2 = vadd.f32 %v3898_v27, %v3909_v0 }
 0x575   : > { %2112 = vrot.lane.b32.xlu1 %v2069_v17, %s3237_s29  ;;  %v3203_v18 = vpop.eup %3202 }
 0x576   : > { %v1993_v56 = vadd.f32 1e-05, %v3203_v18  ;;  %v2072_v32 = vmul.f32 %v3895_v11, %v1992_v4  ;;  %v1849_v11 = vadd.f32 %v3898_v27, %v3913_v35  ;;  %v4011_v35 = vadd.f32 %v3898_v27, %v3931_v36 }
 0x577   : > { %2110 = vrot.lane.b32.xlu0 %v2068_v23, %s3237_s29  ;;  %v3205_v53 = vpop.eup %3204  ;;  %v4029_v36 = vadd.f32 %v3898_v27, %v3954_v21 }
 0x578   : > { %v1990_v31 = vadd.f32 1e-05, %v3205_v53  ;;  %v2073_v15 = vmul.f32 %v3906_v25, %v1993_v56  ;;  %v3997_v25 = vadd.f32 %v3898_v27, %v3919_v40  ;;  %v4015_v40 = vadd.f32 %v3898_v27, %v3933_v55 }
 0x579   : > { %2108 = vrot.lane.b32.xlu1 %v2067_v20, %s3237_s29  ;;  %v3207_v43 = vpop.eup %3206  ;;  %v4044_v55 = vand.u32 127, %v203_v63 }
 0x57a   : > { %v1991_v19 = vadd.f32 1e-05, %v3207_v43  ;;  %v2070_v24 = vmul.f32 %v3890_v26, %v1990_v31  ;;  %v4001_v26 = vadd.f32 %v3898_v27, %v3921_v41  ;;  %v4025_v41 = vadd.f32 %v3898_v27, %v3951_v8 }
 0x57b   : > { %2106 = vrot.lane.b32.xlu0 %v2066_v29, %s3237_s29  ;;  %vm2157_vm1 = vcmp.eq.s32.totalorder %v4044_v55, 1  ;;  %vm2158_vm2 = vcmp.eq.s32.totalorder %v4044_v55, 2  ;;  %vm2156_vm3 = vcmp.eq.s32.totalorder %v4044_v55, 0 }
 0x57c   : > { %v2071_v0 = vmul.f32 %v3900_v28, %v1991_v19  ;;  %v1852_v28 = vadd.f32 %v3898_v27, %v3915_v58  ;;  %v1856_v58 = vadd.f32 %v3898_v27, %v3927_v48  ;;  %v4034_v48 = vadd.f32 %v3898_v27, %v3944_v57 }
 0x57d   : > { %2267 = vperm.xlu1 %2924, %v1848_v2  }
 0x57f   : > { %2118 = vrot.lane.b32.xlu0 %v2072_v32, %s3237_s29 }
 0x581   : > { %2120 = vrot.lane.b32.xlu1 %v2073_v15, %s3237_s29 }
 0x583   : > { %2114 = vrot.lane.b32.xlu0 %v2070_v24, %s3237_s29 }
 0x585   : > { %2116 = vrot.lane.b32.xlu1 %v2071_v0, %s3237_s29 }
 0x587   : > { %2262 = vperm.xlu0 %2923, %v1847_v42  }
 0x589   : > { %2272 = vperm.xlu1 %2924, %v1849_v11  }
 0x58b   : > { %2277 = vperm.xlu0 %2923, %v3997_v25  }
 0x58d   : > { %2282 = vperm.xlu1 %2924, %v4001_v26  }
 0x58f   : > { %2287 = vperm.xlu0 %2923, %v1852_v28  }
 0x591   : > { %2292 = vperm.xlu1 %2924, %v1853_v34  }
 0x593   : > { %2297 = vperm.xlu0 %2923, %v4011_v35  }
 0x595   : > { %2302 = vperm.xlu1 %2924, %v4015_v40  }
 0x597   : > { %2307 = vperm.xlu0 %2923, %v1856_v58  }
 0x599   : > { %2312 = vperm.xlu1 %2924, %v1857_v38  }
 0x59b   : > { %2317 = vperm.xlu0 %2923, %v4025_v41  }
 0x59d   : > { %2322 = vperm.xlu1 %2924, %v4029_v36  }
 0x59f   : > { %2327 = vperm.xlu0 %2923, %v4034_v48   ;;  %v2258_v8 = vpop.permute.xlu1 %2257 }
 0x5a1   : > { %2332 = vperm.xlu1 %2924, %v4039_v50  }
 0x5bc   : > { %v2172_v5 = vpop.permute.xlu1 %2171 }
 0x5bd   : > { %v2241_v32 = vsel %vm2158_vm2, %v2172_v5, 0.0 }
 0x5c0   : > { %v2162_v57 = vpop.permute.xlu0 %2161 }
 0x5c1   : > { %v2239_v21 = vsel %vm2158_vm2, %v2162_v57, 0.0 }
 0x5c2   : > { %v4052_v27 = vsel %vm2157_vm1, %v2258_v8, %v2239_v21  ;;  %v4054_v44 = vpop.permute.xlu1 %2166 }
 0x5c4   : > { %v4056_v3 = vpop.permute.xlu0 %2176 }
 0x5cc   : > { %v4058_v63 = vpop.permute.xlu1 %2191 }
 0x5ce   : > { %v4060_v45 = vpop.permute.xlu0 %2196 }
 0x5d0   : > { %v4062_v46 = vpop.permute.xlu1 %2181 }
 0x5d2   : > { %v4064_v47 = vpop.permute.xlu0 %2186 }
 0x5d4   : > { %v4066_v49 = vpop.permute.xlu1 %2211 }
 0x5d6   : > { %v4068_v51 = vpop.permute.xlu0 %2216 }
 0x5d8   : > { %v4070_v52 = vpop.permute.xlu1 %2201 }
 0x5da   : > { %v2095_v54 = vpop.permute.xlu0 %2094 }
 0x5db   : > { %v2140_v60 = vadd.f32 %v2095_v54, %v1848_v2 }
 0x5dc   : > { %v2097_v61 = vpop.permute.xlu1 %2096 }
 0x5dd   : > { %v2141_v62 = vadd.f32 %v2097_v61, %v1849_v11  ;;  %2363 = vperm.xlu0 %2923, %v2140_v60   ;;  %v2242_v61 = vsel %vm2158_vm2, %v4056_v3, 0.0 }
 0x5de   : > { %v4072_v37 = vpop.permute.xlu0 %2206 }
 0x5df   : > { %2368 = vperm.xlu1 %2924, %v2141_v62  }
 0x5e0   : > { %v2093_v33 = vpop.permute.xlu1 %2092 }
 0x5e1   : > { %v2139_v6 = vadd.f32 %v2093_v33, %v1847_v42 }
 0x5e2   : > { %v2091_v1 = vpop.permute.xlu0 %2090 }
 0x5e3   : > { %v2138_v10 = vadd.f32 %v2091_v1, %v3903_v30  ;;  %2358 = vperm.xlu1 %2924, %v2139_v6  }
 0x5e4   : > { %v4075_v22 = vpop.permute.xlu1 %2231 }
 0x5e5   : > { %2353 = vperm.xlu0 %2923, %v2138_v10   ;;  %v2240_v10 = vsel %vm2158_vm2, %v4054_v44, 0.0 }
 0x5e6   : > { %v4077_v12 = vpop.permute.xlu0 %2236 }
 0x5e8   : > { %v4079_v13 = vpop.permute.xlu1 %2221 }
 0x5ea   : > { %v2103_v14 = vpop.permute.xlu0 %2102 }
 0x5eb   : > { %v2144_v7 = vadd.f32 %v2103_v14, %v1852_v28 }
 0x5ec   : > { %v2105_v16 = vpop.permute.xlu1 %2104 }
 0x5ed   : > { %v2145_v17 = vadd.f32 %v2105_v16, %v1853_v34  ;;  %2383 = vperm.xlu0 %2923, %v2144_v7  }
 0x5ee   : > { %v4081_v9 = vpop.permute.xlu0 %2226 }
 0x5ef   : > { %2388 = vperm.xlu1 %2924, %v2145_v17  }
 0x5f0   : > { %v2101_v23 = vpop.permute.xlu1 %2100 }
 0x5f1   : > { %v2143_v59 = vadd.f32 %v2101_v23, %v4001_v26  ;;  %v2245_v23 = vsel %vm2158_vm2, %v4058_v63, 0.0 }
 0x5f2   : > { %v2099_v30 = vpop.permute.xlu0 %2098 }
 0x5f3   : > { %v2142_v39 = vadd.f32 %v2099_v30, %v3997_v25  ;;  %2378 = vperm.xlu1 %2924, %v2143_v59   ;;  %v2246_v30 = vsel %vm2158_vm2, %v4060_v45, 0.0 }
 0x5f4   : > { %v2113_v20 = vpop.permute.xlu1 %2112 }
 0x5f5   : > { %v2149_v18 = vadd.f32 %v2113_v20, %v1857_v38  ;;  %2373 = vperm.xlu0 %2923, %v2142_v39  }
 0x5f6   : > { %v2111_v29 = vpop.permute.xlu0 %2110 }
 0x5f7   : > { %v2148_v4 = vadd.f32 %v2111_v29, %v1856_v58  ;;  %2408 = vperm.xlu1 %2924, %v2149_v18   ;;  %v2244_v18 = vsel %vm2158_vm2, %v4064_v47, 0.0  ;;  %v2250_v47 = vsel %vm2158_vm2, %v4068_v51, 0.0 }
 0x5f8   : > { %v2109_v53 = vpop.permute.xlu1 %2108 }
 0x5f9   : > { %v2147_v2 = vadd.f32 %v2109_v53, %v4015_v40  ;;  %2403 = vperm.xlu0 %2923, %v2148_v4   ;;  %v2243_v4 = vsel %vm2158_vm2, %v4062_v46, 0.0 }
 0x5fa   : > { %v2107_v56 = vpop.permute.xlu0 %2106 }
 0x5fb   : > { %v2146_v43 = vadd.f32 %v2107_v56, %v4011_v35  ;;  %2398 = vperm.xlu1 %2924, %v2147_v2  }
 0x5fc   : > { %v2268_v31 = vpop.permute.xlu1 %2267 }
 0x5fd   : > { %v2337_v15 = vsel %vm2157_vm1, %v2268_v31, %v2241_v32  ;;  %2393 = vperm.xlu0 %2923, %v2146_v43   ;;  %v2249_v31 = vsel %vm2158_vm2, %v4066_v49, 0.0 }
 0x5fe   : > { %v2119_v19 = vpop.permute.xlu0 %2118 }
 0x5ff   : > { %v2152_v26 = vadd.f32 %v2119_v19, %v4034_v48 }
 0x600   : > { %v2121_v24 = vpop.permute.xlu1 %2120 }
 0x601   : > { %v2153_v28 = vadd.f32 %v2121_v24, %v4039_v50  ;;  %v2248_v24 = vsel %vm2158_vm2, %v4072_v37, 0.0 }
 0x602   : > { %v2115_v0 = vpop.permute.xlu0 %2114 }
 0x603   : > { %v2150_v42 = vadd.f32 %v2115_v0, %v4025_v41 }
 0x604   : > { %v2117_v11 = vpop.permute.xlu1 %2116 }
 0x605   : > { %v2151_v25 = vadd.f32 %v2117_v11, %v4029_v36  ;;  %2413 = vperm.xlu0 %2923, %v2150_v42   ;;  %v2247_v11 = vsel %vm2158_vm2, %v4070_v52, 0.0 }
 0x606   : > { %v2263_v34 = vpop.permute.xlu0 %2262 }
 0x607   : > { %2418 = vperm.xlu1 %2924, %v2151_v25   ;;  %v2336_v3 = vsel %vm2157_vm1, %v2263_v34, %v2240_v10  ;;  %v2251_v34 = vsel %vm2158_vm2, %v4079_v13, 0.0 }
 0x608   : > { %v2273_v35 = vpop.permute.xlu1 %2272 }
 0x609   : > { %2423 = vperm.xlu0 %2923, %v2152_v26   ;;  %v2338_v33 = vsel %vm2157_vm1, %v2273_v35, %v2242_v61 }
 0x60a   : > { %v2278_v40 = vpop.permute.xlu0 %2277 }
 0x60b   : > { %2428 = vperm.xlu1 %2924, %v2153_v28   ;;  %v2339_v2 = vsel %vm2157_vm1, %v2278_v40, %v2243_v4  ;;  %v2252_v40 = vsel %vm2158_vm2, %v4081_v9, 0.0 }
 0x60c   : > { %v2283_v58 = vpop.permute.xlu1 %2282 }
 0x60d   : > { %v2340_v45 = vsel %vm2157_vm1, %v2283_v58, %v2244_v18 }
 0x60e   : > { %v2288_v38 = vpop.permute.xlu0 %2287 }
 0x60f   : > { %v2341_v44 = vsel %vm2157_vm1, %v2288_v38, %v2245_v23 }
 0x610   : > { %v2293_v8 = vpop.permute.xlu1 %2292 }
 0x612   : > { %v2298_v57 = vpop.permute.xlu0 %2297 }
 0x613   : > { %v2343_v26 = vsel %vm2157_vm1, %v2298_v57, %v2247_v11 }
 0x614   : > { %v2303_v41 = vpop.permute.xlu1 %2302 }
 0x615   : > { %v2344_v42 = vsel %vm2157_vm1, %v2303_v41, %v2248_v24 }
 0x616   : > { %v2308_v21 = vpop.permute.xlu0 %2307 }
 0x617   : > { %v2345_v51 = vsel %vm2157_vm1, %v2308_v21, %v2249_v31  ;;  %v2254_v21 = vsel %vm2158_vm2, %v4077_v12, 0.0 }
 0x618   : > { %v2313_v5 = vpop.permute.xlu1 %2312 }
 0x619   : > { %v2346_v32 = vsel %vm2157_vm1, %v2313_v5, %v2250_v47 }
 0x61a   : > { %v4095_v36 = vpop.permute.xlu0 %2317 }
 0x61b   : > { %v2347_v52 = vsel %vm2157_vm1, %v4095_v36, %v2251_v34 }
 0x61c   : > { %v4097_v54 = vpop.permute.xlu1 %2322 }
 0x61d   : > { %v2348_v38 = vsel %vm2157_vm1, %v4097_v54, %v2252_v40 }
 0x61e   : > { %v4099_v48 = vpop.permute.xlu0 %2327 }
 0x620   : > { %v4101_v50 = vpop.permute.xlu1 %2332 }
 0x65c   : > { %v2364_v60 = vpop.permute.xlu0 %2363 }
 0x65d   : > { %v2433_v62 = vsel %vm2156_vm3, %v2364_v60, %v2337_v15 }
 0x65e   : > { %2449 = vst [vmem:[%s4109_s6 + $0x10] sm:$0xff] %v2433_v62  ;;  %v2369_v6 = vpop.permute.xlu1 %2368 }
 0x65f   : > { %v2434_v1 = vsel %vm2156_vm3, %v2369_v6, %v2338_v33 }
 0x660   : > { %2450 = vst [vmem:[%s4109_s6 + $0x18] sm:$0xff] %v2434_v1 }
 0x662   : > { %v2359_v14 = vpop.permute.xlu1 %2358 }
 0x663   : > { %v2432_v7 = vsel %vm2156_vm3, %v2359_v14, %v2336_v3 }
 0x664   : > { %2448 = vst [vmem:[%s4109_s6 + $0x8] sm:$0xff] %v2432_v7  ;;  %v2354_v16 = vpop.permute.xlu0 %2353 }
 0x665   : > { %v2431_v17 = vsel %vm2156_vm3, %v2354_v16, %v4052_v27  ;;  %v2342_v27 = vsel %vm2157_vm1, %v2293_v8, %v2246_v30  ;;  %v2253_v8 = vsel %vm2158_vm2, %v4075_v22, 0.0  ;;  %v2350_v22 = vsel %vm2157_vm1, %v4101_v50, %v2254_v21 }
 0x666   : > { %2447 = vst [vmem:[%s4109_s6] sm:$0xff] %v2431_v17  ;;  %v2349_v9 = vsel %vm2157_vm1, %v4099_v48, %v2253_v8 }
 0x66c   : > { %v2384_v59 = vpop.permute.xlu0 %2383 }
 0x66d   : > { %v2437_v39 = vsel %vm2156_vm3, %v2384_v59, %v2341_v44 }
 0x66e   : > { %2453 = vst [vmem:[%s4109_s6 + $0x30] sm:$0xff] %v2437_v39  ;;  %v2389_v20 = vpop.permute.xlu1 %2388 }
 0x66f   : > { %v2438_v63 = vsel %vm2156_vm3, %v2389_v20, %v2342_v27 }
 0x670   : > { %2454 = vst [vmem:[%s4109_s6 + $0x38] sm:$0xff] %v2438_v63 }
 0x672   : > { %v2379_v29 = vpop.permute.xlu1 %2378 }
 0x673   : > { %v2436_v53 = vsel %vm2156_vm3, %v2379_v29, %v2340_v45 }
 0x674   : > { %2452 = vst [vmem:[%s4109_s6 + $0x28] sm:$0xff] %v2436_v53  ;;  %v2374_v56 = vpop.permute.xlu0 %2373 }
 0x675   : > { %v2435_v43 = vsel %vm2156_vm3, %v2374_v56, %v2339_v2 }
 0x676   : > { %2451 = vst [vmem:[%s4109_s6 + $0x20] sm:$0xff] %v2435_v43  ;;  %v2409_v46 = vpop.permute.xlu1 %2408 }
 0x677   : > { %v2442_v15 = vsel %vm2156_vm3, %v2409_v46, %v2346_v32 }
 0x678   : > { %2458 = vst [vmem:[%s4109_s6 + $0x58] sm:$0xff] %v2442_v15  ;;  %v2404_v19 = vpop.permute.xlu0 %2403 }
 0x679   : > { %v2441_v0 = vsel %vm2156_vm3, %v2404_v19, %v2345_v51 }
 0x67a   : > { %2457 = vst [vmem:[%s4109_s6 + $0x50] sm:$0xff] %v2441_v0  ;;  %v2399_v49 = vpop.permute.xlu1 %2398 }
 0x67b   : > { %v2440_v25 = vsel %vm2156_vm3, %v2399_v49, %v2344_v42 }
 0x67c   : > { %2456 = vst [vmem:[%s4109_s6 + $0x48] sm:$0xff] %v2440_v25  ;;  %v2394_v37 = vpop.permute.xlu0 %2393 }
 0x67d   : > { %v2439_v28 = vsel %vm2156_vm3, %v2394_v37, %v2343_v26 }
 0x67e   : > { %2455 = vst [vmem:[%s4109_s6 + $0x40] sm:$0xff] %v2439_v28 }
 0x684   : > { %v2414_v35 = vpop.permute.xlu0 %2413 }
 0x685   : > { %v2443_v58 = vsel %vm2156_vm3, %v2414_v35, %v2347_v52 }
 0x686   : > { %2459 = vst [vmem:[%s4109_s6 + $0x60] sm:$0xff] %v2443_v58  ;;  %v2419_v13 = vpop.permute.xlu1 %2418 }
 0x687   : > { %v2444_v57 = vsel %vm2156_vm3, %v2419_v13, %v2348_v38 }
 0x688   : > { %2460 = vst [vmem:[%s4109_s6 + $0x68] sm:$0xff] %v2444_v57  ;;  %v2424_v41 = vpop.permute.xlu0 %2423 }
 0x689   : > { %v2445_v5 = vsel %vm2156_vm3, %v2424_v41, %v2349_v9 }
 0x68a   : > { %2461 = vst [vmem:[%s4109_s6 + $0x70] sm:$0xff] %v2445_v5  ;;  %v2429_v36 = vpop.permute.xlu1 %2428 }
 0x68b   : > { %v2446_v54 = vsel %vm2156_vm3, %v2429_v36, %v2350_v22 }
 0x68c   : > { %2462 = vst [vmem:[%s4109_s6 + $0x78] sm:$0xff] %v2446_v54 }
 0x68d PF: > { %s13_s12 = sadd.s32 1, %s3232_s12  }
 0x68e   : > { %p10_p4 = scmp.ge.s32.totalorder %s13_s12, 4  }
 0x690   :  { %12 = sbr.rel (!%p10_p4) target bundleno = 1 (0x1), region = 62 }

</bundles_post_ra>
